<compile_context>
chip_gen: v7x
topology: tpu7x:2x2x1
jax: 0.10.0
libtpu: 0.0.40
codegen_flags: <defaults>
</compile_context>

<pallas_src>
import functools

import numpy as np
import jax
import jax.numpy as jnp
from jax.experimental import pallas as pl
from jax.experimental.pallas import tpu as pltpu


# ---------------------------------------------------------------------------
# Generation-aware VMEM budgets
# ---------------------------------------------------------------------------

def _derive_vmem_budgets():
    phys = None
    try:
        info_fn = getattr(pltpu, "get_tpu_info", None)
        if info_fn is not None:
            phys = getattr(info_fn(), "vmem_capacity_bytes", None)
    except Exception:
        phys = None
    if not phys:
        phys = 64 * 1024 * 1024                      # conservative (v7x-sized) default
    if phys >= 96 * 1024 * 1024:                     # v5e / v6e: 128 MiB per TensorCore
        return 96 * 1024 * 1024, 14 * 1024 * 1024
    return 40 * 1024 * 1024, 6 * 1024 * 1024         # v7x: 64 MiB per TensorCore


_VMEM_LIMIT, _TILE_BUDGET = _derive_vmem_budgets()

# Maps below this pixel count, or with Cout < 8 (the d_out=1 disparity heads),
# stay on XLA: per-grid-step (~0.35us) + launch overhead dominates sub-us tiles
# and a 1-wide output lane produces masked stores.  Kept small so the demo
# driver (32x32 input) exercises the Pallas paths; use ~1024+ at production
# resolutions such as 192x640.
_MIN_PALLAS_PIXELS = 256
_MIN_PALLAS_COUT = 8


# ---------------------------------------------------------------------------
# Helpers
# ---------------------------------------------------------------------------

def _divisors_desc(n):
    ds = set()
    i = 1
    while i * i <= n:
        if n % i == 0:
            ds.add(i)
            ds.add(n // i)
        i += 1
    return sorted(ds, reverse=True)


def _apply_act(y, act):
    if act == "elu":
        # nn.ELU(alpha=1); exp() only ever sees non-positive inputs.
        return jnp.where(y > 0.0, y, jnp.exp(jnp.minimum(y, 0.0)) - 1.0)
    if act == "relu":
        return jnp.maximum(y, 0.0)
    return y


# ---------------------------------------------------------------------------
# Fused 3x3 conv (reflect pad), multi-input, merged-K single MXU dot
# ---------------------------------------------------------------------------

def _conv3x3_kernel(*refs, n_inputs, offsets, mp, act):
    # refs = mains[0..n-1], halos[0..n-1], w, b, out
    #   main_i : (1, th*Wp, Cin_i)        bf16   rows of the padded map
    #   halo_i : (1, 1, 2*Wp+8, Cin_i)    bf16   next-2-rows halo (+ tail pad)
    #   w      : (9*sumCin, Cout)         bf16   tap-major merged weights
    #   b      : (1, Cout)                f32
    #   out    : (1, 1, mp, Cout)                mp = th*Wp (cols W, W+1 junk)
    mains = refs[:n_inputs]
    halos = refs[n_inputs:2 * n_inputs]
    w_ref = refs[2 * n_inputs]
    b_ref = refs[2 * n_inputs + 1]
    o_ref = refs[2 * n_inputs + 2]

    cols = []
    for m_ref, h_ref in zip(mains, halos):
        win = jnp.concatenate([m_ref[0], h_ref[0, 0]], axis=0)   # (rows+halo, Cin_i)
        for off in offsets:                                       # 9 static shifts
            cols.append(win[off:off + mp, :])
    lhs = jnp.concatenate(cols, axis=-1)                          # (mp, 9*sumCin)
    acc = jnp.dot(lhs, w_ref[...], preferred_element_type=jnp.float32)
    out = _apply_act(acc + b_ref[...], act)
    o_ref[0, 0] = out.astype(o_ref.dtype)


def _conv_tile_bytes(th, Wp, sum_cin, cout, halo_len):
    mp = th * Wp
    rows = mp + halo_len
    return int(2 * rows * sum_cin * 2          # double-buffered inputs (main + halo)
               + 2 * mp * cout * 2             # double-buffered bf16 output
               + rows * sum_cin * 2            # concatenated window copy
               + 2.2 * mp * 9 * sum_cin * 2    # shifted windows + merged-K LHS
               + 2 * mp * cout * 4             # f32 accumulator + activation temp
               + 2 * 9 * sum_cin * cout * 2)   # weights (double-buffered)


def _pick_tile_h(H, Wp, sum_cin, cout, want_multi_step=False):
    halo_len = 2 * Wp + 8
    cands = [th for th in _divisors_desc(H) if (th * Wp) % 8 == 0]
    fitting = [th for th in cands
               if _conv_tile_bytes(th, Wp, sum_cin, cout, halo_len) <= _TILE_BUDGET]
    if not fitting:
        return None
    if want_multi_step:                         # >=2 grid steps for v7x's 2 TCs
        split = [th for th in fitting if th < H]
        if split:
            return split[0]
    return fitting[0]


def _conv3x3_pallas_multi(xs, w, b, *, act, out_dtype, tile_h):
    """xs: list of (N,H,W,Cin_i); w: (3,3,sumCin,Cout) f32; b: (1,Cout)."""
    N, H, W, _ = xs[0].shape
    Cout = w.shape[-1]
    Wp = W + 2
    th = tile_h
    assert H % th == 0 and (th * Wp) % 8 == 0
    nh = H // th
    mp = th * Wp
    halo_len = 2 * Wp + 8
    cins = [int(x.shape[-1]) for x in xs]
    sum_cin = sum(cins)

    mains, halos = [], []
    h_starts = np.arange(1, nh + 1, dtype=np.int32) * (th * Wp)
    h_idx = h_starts[:, None] + np.arange(halo_len, dtype=np.int32)[None, :]
    for x in xs:
        ci = int(x.shape[-1])
        xb = x.astype(jnp.bfloat16)
        xpad = jnp.pad(xb, ((0, 0), (1, 1), (1, 1), (0, 0)), mode="reflect")
        xflat = jnp.pad(xpad.reshape(N, (H + 2) * Wp, ci), ((0, 0), (0, 8), (0, 0)))
        mains.append(xflat)                      # read in place, no duplicate copy
        halos.append(xflat[:, h_idx, :])         # tiny: 2 rows (+pad) per tile

    # Merged weights: per-input (tap, channel) order, folds kept in f32.
    offs = np.concatenate([[0], np.cumsum(cins)]).astype(int)
    w_f32 = jnp.asarray(w, jnp.float32)
    w_parts = [w_f32[:, :, offs[i]:offs[i + 1], :].reshape(9 * cins[i], Cout)
               for i in range(len(xs))]
    wk = jnp.concatenate(w_parts, axis=0).astype(jnp.bfloat16)     # (9*sumCin, Cout)
    bk = jnp.asarray(b, jnp.float32).reshape(1, Cout)
    offsets = tuple(dy * Wp + dx for dy in range(3) for dx in range(3))

    in_specs = (
        [pl.BlockSpec((1, mp, ci), lambda n, h: (n, h, 0)) for ci in cins]
        + [pl.BlockSpec((1, 1, halo_len, ci), lambda n, h: (n, h, 0, 0)) for ci in cins]
        + [pl.BlockSpec((9 * sum_cin, Cout), lambda n, h: (0, 0)),
           pl.BlockSpec((1, Cout), lambda n, h: (0, 0))])

    out = pl.pallas_call(
        functools.partial(_conv3x3_kernel, n_inputs=len(xs), offsets=offsets,
                          mp=mp, act=act),
        out_shape=jax.ShapeDtypeStruct((N, nh, mp, Cout), out_dtype),
        grid=(N, nh),
        in_specs=in_specs,
        out_specs=pl.BlockSpec((1, 1, mp, Cout), lambda n, h: (n, h, 0, 0)),
        compiler_params=pltpu.CompilerParams(
            dimension_semantics=("parallel", "parallel"),
            vmem_limit_bytes=_VMEM_LIMIT),
    )(*mains, *halos, wk, bk)

    # Drop the two padded-width junk columns; fuses into the next consumer.
    return out.reshape(N, H, Wp, Cout)[:, :, :W, :]


def _conv3x3_xla(x, w, b, *, act, out_dtype):
    """Small-map / Cout=1 fallback (reflect pad + VALID conv + bias + act)."""
    xp = jnp.pad(x, ((0, 0), (1, 1), (1, 1), (0, 0)), mode="reflect")
    y = jax.lax.conv_general_dilated(
        xp.astype(jnp.float32), jnp.asarray(w, jnp.float32),
        window_strides=(1, 1), padding="VALID",
        dimension_numbers=("NHWC", "HWIO", "NHWC"))
    y = y + jnp.asarray(b, jnp.float32).reshape(1, 1, 1, -1)
    return _apply_act(y, act).astype(out_dtype)


def conv3x3(xs, w, b, *, act=None, out_dtype=jnp.bfloat16):
    """3x3 reflect-pad conv over the (virtual) channel-concat of xs."""
    if not isinstance(xs, (list, tuple)):
        xs = [xs]
    N, H, W, _ = xs[0].shape
    Cout = w.shape[-1]
    sum_cin = sum(int(x.shape[-1]) for x in xs)
    th = None
    if H * W >= _MIN_PALLAS_PIXELS and Cout >= _MIN_PALLAS_COUT:
        th = _pick_tile_h(H, W + 2, sum_cin, Cout, want_multi_step=(N < 2))
    if th is None:
        xcat = xs[0] if len(xs) == 1 else jnp.concatenate(xs, axis=-1)
        return _conv3x3_xla(xcat, w, b, act=act, out_dtype=out_dtype)
    return _conv3x3_pallas_multi(xs, w, b, act=act, out_dtype=out_dtype, tile_h=th)


def conv_block(xs, p):
    return conv3x3(xs, p["w"], p["b"], act="elu")


# ---------------------------------------------------------------------------
# Tiled pointwise (1x1) matmul kernel, multi-input (fSE gated 1x1 conv)
# ---------------------------------------------------------------------------

def _pointwise_kernel(*refs, n_inputs, act):
    xs = refs[:n_inputs]
    w_ref = refs[n_inputs]
    b_ref = refs[n_inputs + 1]
    o_ref = refs[n_inputs + 2]
    lhs = xs[0][0] if n_inputs == 1 else jnp.concatenate([x[0] for x in xs], axis=-1)
    out = jnp.dot(lhs, w_ref[0], preferred_element_type=jnp.float32) + b_ref[...]
    o_ref[0] = _apply_act(out, act).astype(o_ref.dtype)


def _pick_tile_m(M, cin, cout):
    def bytes_for(tm):
        return int(2 * tm * cin * 2 + 2 * tm * cout * 2 + tm * cin * 2
                   + tm * cout * 4 + 2 * cin * cout * 2)
    for tm in _divisors_desc(M):
        if tm != M and tm % 8 != 0:
            continue
        if bytes_for(tm) <= _TILE_BUDGET:
            return tm
    return None


def _pointwise_pallas_multi(xs_flat, w, b, *, act, out_dtype, per_batch_w, tile_m):
    """xs_flat: list of (N, M, Ci); w: (N or 1, sumCi, Cout); b: (1, Cout)."""
    N, M, _ = xs_flat[0].shape
    cins = [int(x.shape[-1]) for x in xs_flat]
    Cin = sum(cins)
    Cout = w.shape[-1]
    tm = tile_m
    assert M % tm == 0 and (tm == M or tm % 8 == 0)
    nm = M // tm
    xs_bf = [x.astype(jnp.bfloat16) for x in xs_flat]
    wk = w.astype(jnp.bfloat16)
    bk = jnp.asarray(b, jnp.float32).reshape(1, Cout)
    w_index = (lambda n, m: (n, 0, 0)) if per_batch_w else (lambda n, m: (0, 0, 0))

    in_specs = ([pl.BlockSpec((1, tm, ci), lambda n, m: (n, m, 0)) for ci in cins]
                + [pl.BlockSpec((1, Cin, Cout), w_index),
                   pl.BlockSpec((1, Cout), lambda n, m: (0, 0))])

    return pl.pallas_call(
        functools.partial(_pointwise_kernel, n_inputs=len(xs_flat), act=act),
        out_shape=jax.ShapeDtypeStruct((N, M, Cout), out_dtype),
        grid=(N, nm),
        in_specs=in_specs,
        out_specs=pl.BlockSpec((1, tm, Cout), lambda n, m: (n, m, 0)),
        compiler_params=pltpu.CompilerParams(
            dimension_semantics=("parallel", "parallel"),
            vmem_limit_bytes=_VMEM_LIMIT),
    )(*xs_bf, wk, bk)


# ---------------------------------------------------------------------------
# Layer glue
# ---------------------------------------------------------------------------

def upsample2(x):
    """Nearest 2x upsample (== F.interpolate(scale_factor=2, mode='nearest'))."""
    return jnp.repeat(jnp.repeat(x, 2, axis=1), 2, axis=2)


def fse_module(high_lowres, lows, p):
    """fSEModule: SE gate from pooled means (pre-upsample; exact), gate folded
    (in f32) into per-batch 1x1 weights, concat + matmul + bias + ReLU fused."""
    high_up = upsample2(high_lowres)
    xs = [high_up] + list(lows)
    N, H, W, _ = high_up.shape
    cins = [int(x.shape[-1]) for x in xs]
    Cin = sum(cins)
    Cout = p["conv_w"].shape[-1]

    # mean(upsample2(x)) == mean(x) exactly, so pool before upsampling.
    pooled = jnp.concatenate(
        [jnp.mean(high_lowres.astype(jnp.float32), axis=(1, 2))]
        + [jnp.mean(l.astype(jnp.float32), axis=(1, 2)) for l in lows], axis=-1)
    hid = jnp.maximum(pooled @ p["fc1"], 0.0)
    gate = jax.nn.sigmoid(hid @ p["fc2"])                              # (N, Cin)
    w_fold = gate[:, :, None] * jnp.asarray(p["conv_w"], jnp.float32)[None]
    bias = jnp.asarray(p["conv_b"], jnp.float32).reshape(1, Cout)

    M = H * W
    tm = _pick_tile_m(M, Cin, Cout) if M >= _MIN_PALLAS_PIXELS else None
    if tm is None:
        cat = jnp.concatenate([x.astype(jnp.float32) for x in xs], axis=-1)
        y = jnp.einsum("nhwc,ncd->nhwd", cat, w_fold) + bias.reshape(1, 1, 1, Cout)
        return jnp.maximum(y, 0.0).astype(jnp.bfloat16)

    xs_flat = [x.reshape(N, M, c) for x, c in zip(xs, cins)]
    out = _pointwise_pallas_multi(xs_flat, w_fold, bias, act="relu",
                                  out_dtype=jnp.bfloat16, per_batch_w=True,
                                  tile_m=tm)
    return out.reshape(N, H, W, Cout)


# ---------------------------------------------------------------------------
# HRDecoder parameters (deterministic synthetic init, mirrors __init__ shapes)
# ---------------------------------------------------------------------------

ALL_POSITION = ["01", "11", "21", "31", "02", "12", "22", "03", "13", "04"]
ATTENTION_POSITION = ["31", "22", "13", "04"]
NON_ATTENTION_POSITION = ["01", "11", "21", "02", "12", "03"]


def _conv3x3_params(key, cin, cout):
    kw, kb = jax.random.split(key)
    return {
        "w": jax.random.normal(kw, (3, 3, cin, cout), jnp.float32) / np.sqrt(9 * cin),
        "b": jax.random.normal(kb, (1, cout), jnp.float32) * 0.01,
    }


def _conv1x1_params(key, cin, cout, bias=True):
    kw, kb = jax.random.split(key)
    b = (jax.random.normal(kb, (1, cout), jnp.float32) * 0.01
         if bias else jnp.zeros((1, cout), jnp.float32))
    return {"w": jax.random.normal(kw, (cin, cout), jnp.float32) / np.sqrt(cin),
            "b": b}


def _fse_params(key, high_c, low_c):
    cin = high_c + low_c
    red = max(cin // 16, 1)
    k1, k2, k3, k4 = jax.random.split(key, 4)
    return {
        "fc1": jax.random.normal(k1, (cin, red), jnp.float32) / np.sqrt(cin),
        "fc2": jax.random.normal(k2, (red, cin), jnp.float32) / np.sqrt(red),
        "conv_w": jax.random.normal(k3, (cin, high_c), jnp.float32) / np.sqrt(cin),
        "conv_b": jax.random.normal(k4, (1, high_c), jnp.float32) * 0.01,
    }


def init_hr_decoder_params(key, num_ch_enc, num_ch_dec, d_out=1):
    num_ch_dec = [max(d_out, c) for c in num_ch_dec]
    params = {}
    keys = iter(jax.random.split(key, 128))

    for j in range(5):
        for i in range(5 - j):
            cin = num_ch_enc[i] if j == 0 else num_ch_dec[i + 1]
            cout = num_ch_dec[i]
            params[f"X_{i}{j}_Conv_0"] = _conv3x3_params(next(keys), cin, cout)
            if i == 0 and j == 4:
                params[f"X_{i}{j}_Conv_1"] = _conv3x3_params(next(keys), cout, num_ch_dec[i])

    for index in ATTENTION_POSITION:
        row, col = int(index[0]), int(index[1])
        high_c = num_ch_dec[row + 1]
        low_c = num_ch_enc[row] + num_ch_dec[row + 1] * (col - 1)
        params[f"X_{index}_attention"] = _fse_params(next(keys), high_c, low_c)

    for index in NON_ATTENTION_POSITION:
        row, col = int(index[0]), int(index[1])
        if col == 1:
            params[f"X_{row + 1}{col - 1}_Conv_1"] = _conv3x3_params(
                next(keys), num_ch_dec[row + 1] + num_ch_enc[row], num_ch_dec[row + 1])
        else:
            params[f"X_{index}_downsample"] = _conv1x1_params(
                next(keys),
                num_ch_dec[row + 1] + num_ch_enc[row] + num_ch_dec[row + 1] * (col - 1),
                num_ch_dec[row + 1] * 2, bias=False)        # Conv1x1 has bias=False
            params[f"X_{row + 1}{col - 1}_Conv_1"] = _conv3x3_params(
                next(keys), num_ch_dec[row + 1] * 2, num_ch_dec[row + 1])

    for i in range(4):
        params[f"dispConvScale{i}"] = _conv3x3_params(next(keys), num_ch_dec[i], d_out)
    return params


# ---------------------------------------------------------------------------
# HRDecoder forward (mirrors the PyTorch control flow)
# ---------------------------------------------------------------------------

def hr_decoder_forward(params, input_features_nchw):
    # NCHW -> NHWC, bf16 activations.
    feats = {f"X_{i}0": jnp.transpose(f, (0, 2, 3, 1)).astype(jnp.bfloat16)
             for i, f in enumerate(input_features_nchw)}

    for index in ALL_POSITION:
        row, col = int(index[0]), int(index[1])
        lows = [feats[f"X_{row}{i}"] for i in range(col)]
        c0 = f"X_{row + 1}{col - 1}_Conv_0"
        high = conv_block(feats[f"X_{row + 1}{col - 1}"], params[c0])
        if index in ATTENTION_POSITION:
            feats[f"X_{index}"] = fse_module(high, lows, params[f"X_{index}_attention"])
        else:
            c1 = f"X_{row + 1}{col - 1}_Conv_1"
            w1, b1 = params[c1]["w"], params[c1]["b"]
            if col != 1:
                # Fold the bias-free 1x1 downsample into the 3x3 conv weights
                # (f32, exact): conv3x3(conv1x1(x)) == conv3x3 with W1x1 @ W3x3.
                w1 = jnp.einsum("ab,ijbc->ijac",
                                params[f"X_{index}_downsample"]["w"], w1)
            # concat is fused into the conv kernel (list of inputs).
            feats[f"X_{index}"] = conv3x3([upsample2(high)] + lows, w1, b1, act="elu")

    x = conv_block(feats["X_04"], params["X_04_Conv_0"])
    x = conv_block(upsample2(x), params["X_04_Conv_1"])

    def disp_head(t, name):
        # Cout = d_out = 1 -> stays on XLA (lane-sparse output, masked stores).
        d = conv3x3(t, params[name]["w"], params[name]["b"],
                    act=None, out_dtype=jnp.float32)
        return jnp.transpose(d, (0, 3, 1, 2))           # back to NCHW

    return {
        ("disp", 0): disp_head(x, "dispConvScale0"),
        ("disp", 1): disp_head(feats["X_04"], "dispConvScale1"),
        ("disp", 2): disp_head(feats["X_13"], "dispConvScale2"),
        ("disp", 3): disp_head(feats["X_22"], "dispConvScale3"),
    }


# ---------------------------------------------------------------------------
# Driver
# ---------------------------------------------------------------------------

if __name__ == "__main__":
    num_ch_enc = [16, 16, 32, 32, 64]
    num_ch_dec = [16, 16, 32, 32, 64]
    d_out = 1
    B, H0, W0 = 2, 32, 32

    key = jax.random.PRNGKey(0)
    pkey, xkey, tkey = jax.random.split(key, 3)

    # --- Self-check 1: multi-input halo conv (forced nh=4 row-tile path) -----
    tk = jax.random.split(tkey, 6)
    x1 = jax.random.normal(tk[0], (2, 16, 20, 8), jnp.float32)
    x2 = jax.random.normal(tk[1], (2, 16, 20, 24), jnp.float32)
    wt = (jax.random.normal(tk[2], (3, 3, 32, 16), jnp.float32) / np.sqrt(9 * 32)
          ).astype(jnp.bfloat16).astype(jnp.float32)
    bt = jax.random.normal(tk[3], (1, 16), jnp.float32) * 0.01
    got = _conv3x3_pallas_multi([x1, x2], wt, bt, act="elu",
                                out_dtype=jnp.bfloat16, tile_h=4)
    ref = _conv3x3_xla(jnp.concatenate([x1, x2], -1).astype(jnp.bfloat16), wt, bt,
                       act="elu", out_dtype=jnp.float32)
    np.testing.assert_allclose(np.asarray(got.astype(jnp.float32)), np.asarray(ref),
                               rtol=0.1, atol=0.05)

    # --- Self-check 2: multi-input per-batch pointwise (fSE matmul) ----------
    M = 16 * 20
    p1 = x1.reshape(2, M, 8)
    p2 = x2.reshape(2, M, 24)
    wp = (jax.random.normal(tk[4], (2, 32, 16), jnp.float32) / np.sqrt(32)
          ).astype(jnp.bfloat16).astype(jnp.float32)
    bp = jax.random.normal(tk[5], (1, 16), jnp.float32) * 0.01
    gotp = _pointwise_pallas_multi([p1, p2], wp, bp, act="relu",
                                   out_dtype=jnp.bfloat16, per_batch_w=True,
                                   tile_m=40)
    cat = jnp.concatenate([p1, p2], -1).astype(jnp.bfloat16).astype(jnp.float32)
    refp = jnp.maximum(jnp.einsum("nmc,ncd->nmd", cat, wp) + bp.reshape(1, 1, 16), 0.0)
    np.testing.assert_allclose(np.asarray(gotp.astype(jnp.float32)), np.asarray(refp),
                               rtol=0.1, atol=0.05)

    # --- Full decoder forward -------------------------------------------------
    params = init_hr_decoder_params(pkey, num_ch_enc, num_ch_dec, d_out)
    xkeys = jax.random.split(xkey, 5)
    # Encoder features, PyTorch NCHW convention; scale i has spatial H0 / 2^i.
    input_features = [
        jax.random.normal(
            xkeys[i],
            (B, num_ch_enc[i], H0 // (2 ** i), W0 // (2 ** i)),
            jnp.float32)
        for i in range(5)
    ]

    forward = jax.jit(hr_decoder_forward)
    outputs = forward(params, input_features)
    outputs = jax.tree_util.tree_map(jax.block_until_ready, outputs)

    assert outputs[("disp", 0)].shape == (B, d_out, 2 * H0, 2 * W0)
    assert outputs[("disp", 1)].shape == (B, d_out, H0, W0)
    assert outputs[("disp", 2)].shape == (B, d_out, H0 // 2, W0 // 2)
    assert outputs[("disp", 3)].shape == (B, d_out, H0 // 4, W0 // 4)
    assert all(np.isfinite(np.asarray(v)).all() for v in outputs.values())

    print("KERNEL_OK")
</pallas_src>

<mosaic_0001>
module attributes {stable_mosaic.version = 11 : i64} {
  func.func @_conv3x3_kernel(%arg0: i32, %arg1: i32, %arg2: memref<1x88x8xbf16, #tpu.memory_space<vmem>>, %arg3: memref<1x88x24xbf16, #tpu.memory_space<vmem>>, %arg4: memref<1x1x52x8xbf16, #tpu.memory_space<vmem>>, %arg5: memref<1x1x52x24xbf16, #tpu.memory_space<vmem>>, %arg6: memref<288x16xbf16, #tpu.memory_space<vmem>>, %arg7: memref<1x16xf32, #tpu.memory_space<vmem>>, %arg8: memref<1x1x88x16xbf16, #tpu.memory_space<vmem>>) attributes {dimension_semantics = [#tpu.dimension_semantics<parallel>, #tpu.dimension_semantics<parallel>], iteration_bounds = array<i64: 2, 4>, scalar_prefetch = 0 : i64, scratch_operands = 0 : i64, tpu.core_type = #tpu.core_type<tc>, window_params = [{transform_indices = @transform_0, window_bounds = array<i64: 1, 88, 8>}, {transform_indices = @transform_1, window_bounds = array<i64: 1, 88, 24>}, {transform_indices = @transform_2, window_bounds = array<i64: 1, 1, 52, 8>}, {transform_indices = @transform_3, window_bounds = array<i64: 1, 1, 52, 24>}, {pipeline_mode = #tpu.pipeline_mode<synchronous>, transform_indices = @transform_4, window_bounds = array<i64: 288, 16>}, {pipeline_mode = #tpu.pipeline_mode<synchronous>, transform_indices = @transform_5, window_bounds = array<i64: 1, 16>}, {transform_indices = @transform_6, window_bounds = array<i64: 1, 1, 88, 16>}]} {
    %c0 = arith.constant 0 : index
    %c0_0 = arith.constant 0 : index
    %c0_1 = arith.constant 0 : index
    %0 = vector.load %arg2[%c0, %c0_0, %c0_1] : memref<1x88x8xbf16, #tpu.memory_space<vmem>>, vector<1x88x8xbf16>
    %1 = vector.shape_cast %0 : vector<1x88x8xbf16> to vector<88x8xbf16>
    %c0_2 = arith.constant 0 : index
    %c0_3 = arith.constant 0 : index
    %c0_4 = arith.constant 0 : index
    %c0_5 = arith.constant 0 : index
    %2 = vector.load %arg4[%c0_2, %c0_3, %c0_4, %c0_5] : memref<1x1x52x8xbf16, #tpu.memory_space<vmem>>, vector<1x1x52x8xbf16>
    %3 = vector.shape_cast %2 : vector<1x1x52x8xbf16> to vector<52x8xbf16>
    %4 = tpu.concatenate %1, %3 in 0 : vector<88x8xbf16>, vector<52x8xbf16> -> vector<140x8xbf16>
    %5 = vector.extract_strided_slice %4 {offsets = [0, 0], sizes = [88, 8], strides = [1, 1]} : vector<140x8xbf16> to vector<88x8xbf16>
    %6 = vector.extract_strided_slice %4 {offsets = [1, 0], sizes = [88, 8], strides = [1, 1]} : vector<140x8xbf16> to vector<88x8xbf16>
    %7 = vector.extract_strided_slice %4 {offsets = [2, 0], sizes = [88, 8], strides = [1, 1]} : vector<140x8xbf16> to vector<88x8xbf16>
    %8 = vector.extract_strided_slice %4 {offsets = [22, 0], sizes = [88, 8], strides = [1, 1]} : vector<140x8xbf16> to vector<88x8xbf16>
    %9 = vector.extract_strided_slice %4 {offsets = [23, 0], sizes = [88, 8], strides = [1, 1]} : vector<140x8xbf16> to vector<88x8xbf16>
    %10 = vector.extract_strided_slice %4 {offsets = [24, 0], sizes = [88, 8], strides = [1, 1]} : vector<140x8xbf16> to vector<88x8xbf16>
    %11 = vector.extract_strided_slice %4 {offsets = [44, 0], sizes = [88, 8], strides = [1, 1]} : vector<140x8xbf16> to vector<88x8xbf16>
    %12 = vector.extract_strided_slice %4 {offsets = [45, 0], sizes = [88, 8], strides = [1, 1]} : vector<140x8xbf16> to vector<88x8xbf16>
    %13 = vector.extract_strided_slice %4 {offsets = [46, 0], sizes = [88, 8], strides = [1, 1]} : vector<140x8xbf16> to vector<88x8xbf16>
    %c0_6 = arith.constant 0 : index
    %c0_7 = arith.constant 0 : index
    %c0_8 = arith.constant 0 : index
    %14 = vector.load %arg3[%c0_6, %c0_7, %c0_8] : memref<1x88x24xbf16, #tpu.memory_space<vmem>>, vector<1x88x24xbf16>
    %15 = vector.shape_cast %14 : vector<1x88x24xbf16> to vector<88x24xbf16>
    %c0_9 = arith.constant 0 : index
    %c0_10 = arith.constant 0 : index
    %c0_11 = arith.constant 0 : index
    %c0_12 = arith.constant 0 : index
    %16 = vector.load %arg5[%c0_9, %c0_10, %c0_11, %c0_12] : memref<1x1x52x24xbf16, #tpu.memory_space<vmem>>, vector<1x1x52x24xbf16>
    %17 = vector.shape_cast %16 : vector<1x1x52x24xbf16> to vector<52x24xbf16>
    %18 = tpu.concatenate %15, %17 in 0 : vector<88x24xbf16>, vector<52x24xbf16> -> vector<140x24xbf16>
    %19 = vector.extract_strided_slice %18 {offsets = [0, 0], sizes = [88, 24], strides = [1, 1]} : vector<140x24xbf16> to vector<88x24xbf16>
    %20 = vector.extract_strided_slice %18 {offsets = [1, 0], sizes = [88, 24], strides = [1, 1]} : vector<140x24xbf16> to vector<88x24xbf16>
    %21 = vector.extract_strided_slice %18 {offsets = [2, 0], sizes = [88, 24], strides = [1, 1]} : vector<140x24xbf16> to vector<88x24xbf16>
    %22 = vector.extract_strided_slice %18 {offsets = [22, 0], sizes = [88, 24], strides = [1, 1]} : vector<140x24xbf16> to vector<88x24xbf16>
    %23 = vector.extract_strided_slice %18 {offsets = [23, 0], sizes = [88, 24], strides = [1, 1]} : vector<140x24xbf16> to vector<88x24xbf16>
    %24 = vector.extract_strided_slice %18 {offsets = [24, 0], sizes = [88, 24], strides = [1, 1]} : vector<140x24xbf16> to vector<88x24xbf16>
    %25 = vector.extract_strided_slice %18 {offsets = [44, 0], sizes = [88, 24], strides = [1, 1]} : vector<140x24xbf16> to vector<88x24xbf16>
    %26 = vector.extract_strided_slice %18 {offsets = [45, 0], sizes = [88, 24], strides = [1, 1]} : vector<140x24xbf16> to vector<88x24xbf16>
    %27 = vector.extract_strided_slice %18 {offsets = [46, 0], sizes = [88, 24], strides = [1, 1]} : vector<140x24xbf16> to vector<88x24xbf16>
    %28 = tpu.concatenate %5, %6, %7, %8, %9, %10, %11, %12, %13, %19, %20, %21, %22, %23, %24, %25 in 1 : vector<88x8xbf16>, vector<88x8xbf16>, vector<88x8xbf16>, vector<88x8xbf16>, vector<88x8xbf16>, vector<88x8xbf16>, vector<88x8xbf16>, vector<88x8xbf16>, vector<88x8xbf16>, vector<88x24xbf16>, vector<88x24xbf16>, vector<88x24xbf16>, vector<88x24xbf16>, vector<88x24xbf16>, vector<88x24xbf16>, vector<88x24xbf16> -> vector<88x240xbf16>
    %29 = tpu.concatenate %26, %27 in 1 : vector<88x24xbf16>, vector<88x24xbf16> -> vector<88x48xbf16>
    %30 = tpu.concatenate %28, %29 in 1 : vector<88x240xbf16>, vector<88x48xbf16> -> vector<88x288xbf16>
    %c0_13 = arith.constant 0 : index
    %c0_14 = arith.constant 0 : index
    %31 = vector.load %arg6[%c0_13, %c0_14] : memref<288x16xbf16, #tpu.memory_space<vmem>>, vector<288x16xbf16>
    %cst = arith.constant dense<0.000000e+00> : vector<88x16xf32>
    %32 = tpu.matmul %30, %31, %cst {dimension_numbers = #tpu.dot_dimension_numbers<[1], [0], [0], [1], [0, 0, 1, 1], [], []>} : vector<88x288xbf16>, vector<288x16xbf16>, vector<88x16xf32> -> vector<88x16xf32>
    %c0_15 = arith.constant 0 : index
    %c0_16 = arith.constant 0 : index
    %33 = vector.load %arg7[%c0_15, %c0_16] : memref<1x16xf32, #tpu.memory_space<vmem>>, vector<1x16xf32>
    %34 = vector.broadcast %33 : vector<1x16xf32> to vector<88x16xf32>
    %35 = arith.addf %32, %34 : vector<88x16xf32>
    %cst_17 = arith.constant 0.000000e+00 : f32
    %36 = vector.broadcast %cst_17 : f32 to vector<88x16xf32>
    %37 = arith.cmpf ogt, %35, %36 : vector<88x16xf32>
    %cst_18 = arith.constant 0.000000e+00 : f32
    %38 = vector.broadcast %cst_18 : f32 to vector<88x16xf32>
    %39 = arith.minimumf %35, %38 : vector<88x16xf32>
    %40 = math.exp %39 : vector<88x16xf32>
    %cst_19 = arith.constant 1.000000e+00 : f32
    %41 = vector.broadcast %cst_19 : f32 to vector<88x16xf32>
    %42 = arith.subf %40, %41 : vector<88x16xf32>
    %43 = arith.select %37, %35, %42 : vector<88x16xi1>, vector<88x16xf32>
    %44 = arith.truncf %43 : vector<88x16xf32> to vector<88x16xbf16>
    %c0_20 = arith.constant 0 : index
    %c0_21 = arith.constant 0 : index
    %c0_22 = arith.constant 0 : index
    %c0_23 = arith.constant 0 : index
    %45 = vector.load %arg8[%c0_20, %c0_21, %c0_22, %c0_23] : memref<1x1x88x16xbf16, #tpu.memory_space<vmem>>, vector<1x1x88x16xbf16>
    %46 = vector.shape_cast %45 : vector<1x1x88x16xbf16> to vector<88x16xbf16>
    %47 = vector.shape_cast %44 : vector<88x16xbf16> to vector<1x1x88x16xbf16>
    tpu.vector_store %arg8[%c0_20, %c0_21, %c0_22, %c0_23], %47 {strides = array<i32>} : memref<1x1x88x16xbf16, #tpu.memory_space<vmem>>, vector<1x1x88x16xbf16>,
    return
  }
  func.func @transform_0(%arg0: i32, %arg1: i32) -> (i32, i32, i32) {
    %c0_i32 = arith.constant 0 : i32
    %c0_i32_0 = arith.constant 0 : i32
    return %arg0, %arg1, %c0_i32 : i32, i32, i32
  }
  func.func @transform_1(%arg0: i32, %arg1: i32) -> (i32, i32, i32) {
    %c0_i32 = arith.constant 0 : i32
    %c0_i32_0 = arith.constant 0 : i32
    return %arg0, %arg1, %c0_i32 : i32, i32, i32
  }
  func.func @transform_2(%arg0: i32, %arg1: i32) -> (i32, i32, i32, i32) {
    %c0_i32 = arith.constant 0 : i32
    %c0_i32_0 = arith.constant 0 : i32
    %c0_i32_1 = arith.constant 0 : i32
    return %arg0, %arg1, %c0_i32, %c0_i32_0 : i32, i32, i32, i32
  }
  func.func @transform_3(%arg0: i32, %arg1: i32) -> (i32, i32, i32, i32) {
    %c0_i32 = arith.constant 0 : i32
    %c0_i32_0 = arith.constant 0 : i32
    %c0_i32_1 = arith.constant 0 : i32
    return %arg0, %arg1, %c0_i32, %c0_i32_0 : i32, i32, i32, i32
  }
  func.func @transform_4(%arg0: i32, %arg1: i32) -> (i32, i32) {
    %c0_i32 = arith.constant 0 : i32
    %c0_i32_0 = arith.constant 0 : i32
    %c0_i32_1 = arith.constant 0 : i32
    return %c0_i32, %c0_i32_0 : i32, i32
  }
  func.func @transform_5(%arg0: i32, %arg1: i32) -> (i32, i32) {
    %c0_i32 = arith.constant 0 : i32
    %c0_i32_0 = arith.constant 0 : i32
    %c0_i32_1 = arith.constant 0 : i32
    return %c0_i32, %c0_i32_0 : i32, i32
  }
  func.func @transform_6(%arg0: i32, %arg1: i32) -> (i32, i32, i32, i32) {
    %c0_i32 = arith.constant 0 : i32
    %c0_i32_0 = arith.constant 0 : i32
    %c0_i32_1 = arith.constant 0 : i32
    return %arg0, %arg1, %c0_i32, %c0_i32_0 : i32, i32, i32, i32
  }
}

</mosaic_0001>

<bundles_post_ra>
// kernel: tpu_custom_call.1
= control target key start
LH: loop header
LB: loop body
LE: loop exit
PB: predicated region body
PF: predicated region fallthrough
CT: control target
= control target key end

     0   :  { %s2374_s21 = smov 0   ;;  %s2376_s22 = smov 0   ;;  %s3434_s0 = inlined_call_operand.vmem [shape: bf16[2,404,8], index: 0, kind: input, shape index: {}]   ;;  %s3435_s1 = inlined_call_operand.vmem [shape: bf16[2,404,24], index: 1, kind: input, shape index: {}]   ;;  %s3436_s2 = inlined_call_operand.vmem [shape: bf16[2,4,52,8], index: 2, kind: input, shape index: {}]   ;;  %s3437_s3 = inlined_call_operand.vmem [shape: bf16[2,4,52,24], index: 3, kind: input, shape index: {}]   ;;  %s3438_s4 = inlined_call_operand.vmem [shape: bf16[288,16], index: 4, kind: input, shape index: {}]   ;;  %s3439_s5 = inlined_call_operand.vmem [shape: f32[1,16], index: 5, kind: input, shape index: {}]   ;;  %s3440_s6 = inlined_call_operand.vmem [shape: bf16[2,4,88,16], index: 6, kind: output, shape index: {}]  }
   0x1   :  { %s2378_s23 = smov 0   ;;  %s2380_s24 = smov 0  }
   0x2   :  { %s2382_s25 = smov 0  }
   0x3 LB: > { %s25_s26 = sadd.s32 1, %s2316_s23  ;;  %s28_s27 = sadd.s32 1, %s2320_s24  ;;  %s2324_s25 = sphi %s2382_s25, %s16_s25   ;;  %s2320_s24 = sphi %s2380_s24, %s3494_s24   ;;  %s2316_s23 = sphi %s2378_s23, %s3493_s23   ;;  %s2312_s22 = sphi %s2376_s22, %s3492_s22   ;;  %s2308_s21 = sphi %s2374_s21, %s3491_s21  }
   0x4   : > { %p26_p0 = scmp.ge.s32.totalorder %s25_s26, 4  ;;  %p1983_p1 = scmp.ge.s32.totalorder %s2324_s25, 1 }
   0x5   : > { %p298_p2 = scmp.lt.s32.totalorder %s2324_s25, 9 }
   0x6   : > { %s3496_s26 = smov (%p26_p0, %s25_s26), 0  ;;  %s3498_s27 = smov (!%p26_p0, %s28_s27), %s2320_s24 }
   0x7   : > { %p299_p3 = pnand %p1983_p1, %p298_p2  ;;  %p30_p4 = scmp.ge.s32.totalorder %s3498_s27, 2 }
   0x8   : > { %s371_s28 = smul.u32 (!%p299_p3), 11, %s2308_s21  ;;  %p376_p5 = scmp.lt.s32.totalorder (!%p299_p3), %s2312_s22, 1  ;;  %vm654_vm0 = vcmask (!%p299_p3), 1044480   ;;  %vm630_vm1 = vcmask (!%p299_p3), 1046528   ;;  %vm499_vm2 = vcmask (!%p299_p3), 1043456   ;;  %vm743_vm6 = vcmask (!%p299_p3), 1041408  }
   0x9   : > { %s3500_s27 = smov (%p30_p4, %s3498_s27), 0  ;;  %302 = sbr.rel (%p299_p3) target bundleno = 595 (0x253), region = 44 }
   0xa   : > { %p378_p6 = scmp.lt.s32.totalorder (!%p299_p3), %s371_s28, 50  ;;  %p409_p7 = scmp.lt.s32.totalorder (!%p299_p3), %s2308_s21, 3  ;;  %vm570_vm3 = vsmask.f32 (!%p299_p3), 7424  ;;  %vm678_vm4 = vsmask.f32 (!%p299_p3), 4352 }
   0xb   : > { %s2329_s10 = smov (!%p299_p3), 40   ;;  %vm3466_vm5 = vsmask.f32 (!%p299_p3), 1280  ;;  %s2330_s11 = smov (!%p299_p3), 32   ;;  %vm819_vm7 = vcmask (!%p299_p3), 1040384   ;;  %vm1076_vm8 = vcmask (!%p299_p3), 195584  }
   0xc   : > { %s3462_s13 = smov (!%p299_p3), 120   ;;  %s3464_s14 = smov (!%p299_p3), 48   ;;  %vm1050_vm9 = vcmask (!%p299_p3), 64512   ;;  %vm1063_vm10 = vcmask (!%p299_p3), 130048   ;;  %vm1089_vm11 = vcmask (!%p299_p3), 261120   ;;  %vm1102_vm12 = vcmask (!%p299_p3), 326656  }
   0xd   : > { %s2335_s18 = smov (!%p299_p3), 88   ;;  %s2336_s19 = smov (!%p299_p3), 72   ;;  %vm1115_vm13 = vcmask (!%p299_p3), 392192   ;;  %vm1128_vm14 = vcmask (!%p299_p3), 457728   ;;  %vm1141_vm15 = vcmask (!%p299_p3), 523264  }
  0x10   : > { %s3502_s22 = smov (!%p376_p5, %s2312_s22), 1  ;;  %s3504_s28 = smov (!%p378_p6, %s371_s28), 50 }
  0x11   : > { %s2161_s29 = smul.u32 51, %s3502_s22  ;;  %s3506_s21 = smov (!%p409_p7, %s2308_s21), 3 }
  0x12   : > { %s2163_s7 = smul.u32 28, %s3502_s22 }
  0x13   : > { %s381_s30 = sadd.s32 %s2161_s29, %s3504_s28  ;;  %s2162_s9 = smul.u32 7, %s3506_s21 }
  0x14   : > { %s1984_s8 = sshll.u32 %s381_s30, 2  ;;  %s2326_s28 = smov 24  }
  0x15   : > { %s2414_s12 = scalar_lea.vmem %s3434_s0, %s1984_s8  ;;  %s2419_s15 = scalar_lea.vmem %s3435_s1, %s1984_s8 }
  0x16   : > { %s2421_s16 = sadd.s32 %s2163_s7, %s2162_s9  ;;  %v2424_v0 = vld [vmem:[%s2414_s12 + $0x8] sm:$0xff]   ;;  %v2427_v1 = vld [vmem:[%s2414_s12 + $0x10] sm:$0xff]   ;;  %v2431_v2 = vld [vmem:[%s2414_s12] sm:$0xff]   ;;  %s3460_s29 = smov 16  }
  0x17   : > { %s1986_s17 = sshll.u32 %s2421_s16, 2  ;;  %v655_v3 = vrot.slane %v2424_v0, 3  ;;  %v656_v4 = vrot.slane %v2427_v1, 3  ;;  %v632_v5 = vrot.slane %v2424_v0, 1  ;;  %v2444_v6 = vld [vmem:[%s2419_s15 + $0x20] sm:$0xff]   ;;  %v631_v7 = vrot.slane %v2431_v2, 1 }
  0x18   : > { %s2438_s20 = scalar_lea.vmem %s3437_s3, %s1986_s17  ;;  %v2223_v10 = vld [vmem:[%s2419_s15 + $0x28] ss:$0 sps:$4 sm:$0xff]   ;;  %v890_v13 = vshll.u32 %v2444_v6, 16  ;;  %v894_v14 = vshrl.u32 %v2444_v6, 16  ;;  %v2480_v26 = vld [vmem:[%s2419_s15 + $0x10] sm:$0xff]   ;;  %v2483_v27 = vld [vmem:[%s2419_s15 + $0x18] sm:$0xff]   ;;  %s2539_s8 = scalar_lea.vmem %s3436_s2, %s1986_s17 }
  0x19   : > { %v2448_v8 = vld [vmem:[%s2438_s20 + $0xc] sm:$0xff]   ;;  %v657_v9 = vsel %vm654_vm0, %v655_v3, %v656_v4  ;;  %v2224_v11 = vld [vmem:[%s2438_s20] ss:$0 sps:$4 sm:$0xff]   ;;  %v633_v12 = vsel %vm630_vm1, %v631_v7, %v632_v5  ;;  %v2466_v16 = vld [vmem:[%s2438_s20 + $0x14] sm:$0x3f]   ;;  %v572_v29 = vshrl.u32 %v2431_v2, 16 }
  0x1a   : > { %666 = vrot.lane.b32.xlu1 %v657_v9, %s2326_s28  ;;  %642 = vrot.lane.b32.xlu0 %v633_v12, %s3460_s29  ;;  %v2463_v15 = vsel %vm499_vm2, %v2223_v10, %v2224_v11  ;;  %v892_v17 = vrot.slane %v890_v13, 1  ;;  %v1252_v19 = vshll.u32 %v2448_v8, 16  ;;  %v1256_v20 = vshrl.u32 %v2448_v8, 16  ;;  %v2494_v36 = vld [vmem:[%s2438_s20 + $0x4] sm:$0xff]   ;;  %v2549_v61 = vld [vmem:[%s2414_s12 + $0x18] sm:$0xff]   ;;  %s3456_s9 = smov 8  }
  0x1b   : > { %v897_v18 = vshll.u32 %v2463_v15, 16  ;;  %v1260_v21 = vshll.u32 %v2466_v16, 16  ;;  %v1264_v22 = vshrl.u32 %v2466_v16, 16  ;;  %v574_v30 = vshll.u32 %v2431_v2, 16  ;;  %v2558_v9 = vld [vmem:[%s2419_s15] sm:$0xff]   ;;  %v2561_v10 = vld [vmem:[%s2419_s15 + $0x8] sm:$0xff]  }
  0x1c   : > { %v896_v23 = vor.u32 %v894_v14, %v892_v17  ;;  %v1254_v25 = vrot.slane %v1252_v19, 1  ;;  %v579_v31 = vshll.u32 %v2424_v0, 16  ;;  %v874_v34 = vshll.u32 %v2480_v26, 16  ;;  %s2333_s16 = smov 56   ;;  %s2334_s17 = smov 64  }
  0x1d   : > { %v899_v24 = vrot.slane %v897_v18, 1  ;;  %v1262_v28 = vrot.slane %v1260_v21, 1  ;;  %v878_v35 = vshrl.u32 %v2480_v26, 16  ;;  %v882_v38 = vshll.u32 %v2483_v27, 16  ;;  %s3458_s30 = smov 96   ;;  %s3482_s7 = smov 120  }
  0x1e   : > { %v1258_v33 = vor.u32 %v1256_v20, %v1254_v25  ;;  %v886_v39 = vshrl.u32 %v2483_v27, 16  ;;  %v576_v40 = vrot.slane %v574_v30, 1  ;;  %v2503_v42 = vrot.slane %v874_v34, 1 }
  0x1f   : > { %v2489_v32 = vsel %vm570_vm3, %v896_v23, %v899_v24  ;;  %v1266_v37 = vor.u32 %v1264_v22, %v1262_v28  ;;  %v2505_v43 = vrot.slane %v579_v31, 1  ;;  %v884_v44 = vrot.slane %v882_v38, 1 }
  0x20   : > { %1271 = vrot.lane.b32.xlu1 %v2489_v32, %s2326_s28  ;;  %v1263_v41 = vsel %vm570_vm3, %v1258_v33, %v1262_v28  ;;  %v577_v45 = vor.u32 %v576_v40, %v572_v29  ;;  %v985_v46 = vshll.u32 %v2494_v36, 16  ;;  %v880_v47 = vor.u32 %v878_v35, %v2503_v42 }
  0x21   : > { %1279 = vrot.lane.b32.xlu0 %v1266_v37, %s2326_s28  ;;  %v982_v48 = vshrl.u32 %v2494_v36, 16  ;;  %v583_v49 = vshrl.u32 %v2424_v0, 16  ;;  %v2517_v50 = vshll.u32 %v2427_v1, 16  ;;  %v888_v51 = vor.u32 %v886_v39, %v884_v44 }
  0x22   : > { %v1248_v52 = vrot.slane %v985_v46, 1  ;;  %v2525_v53 = vshrl.u32 %v2427_v1, 16  ;;  %v2528_v54 = vsel %vm570_vm3, %v880_v47, %v884_v44  ;;  %v582_v55 = vsel %vm570_vm3, %v577_v45, %v2505_v43 }
  0x23   : > { %v720_v56 = vrot.slane %v2424_v0, 4  ;;  %v721_v57 = vrot.slane %v2427_v1, 4  ;;  %v2544_v58 = vsel %vm570_vm3, %v888_v51, %v892_v17  ;;  %v679_v59 = vrot.slane %v583_v49, 3 }
  0x24   : > { %1277 = vrot.lane.b32.xlu1 %v1263_v41, %s2326_s28  ;;  %v680_v60 = vrot.slane %v579_v31, 4  ;;  %v1250_v62 = vor.u32 %v1248_v52, %v982_v48  ;;  %v682_v63 = vrot.slane %v2525_v53, 3  ;;  %v683_v3 = vrot.slane %v2517_v50, 4 }
  0x25   : > { %1267 = vrot.lane.b32.xlu0 %v2528_v54, %s2326_s28  ;;  %v901_v7 = vshrl.u32 %v2463_v15, 16  ;;  %v722_v11 = vsel %vm499_vm2, %v720_v56, %v721_v57  ;;  %v2573_v17 = vshll.u32 %v2549_v61, 16  ;;  %v2576_v19 = vshrl.u32 %v2549_v61, 16 }
  0x26   : > { %v1255_v20 = vsel %vm570_vm3, %v1250_v62, %v1254_v25  ;;  %v681_v21 = vor.u32 %v680_v60, %v679_v59  ;;  %v2579_v22 = vor.u32 %v683_v3, %v682_v63  ;;  %v917_v28 = vrot.slane %v2561_v10, 1 }
  0x27   : > { %v2568_v12 = vor.u32 %v901_v7, %v899_v24  ;;  %v916_v24 = vrot.slane %v2558_v9, 1  ;;  %v770_v29 = vrot.slane %v2525_v53, 6  ;;  %v771_v30 = vrot.slane %v2517_v50, 7 }
  0x28   : > { %617 = vrot.lane.b32.xlu1 %v582_v55, %s3456_s9  ;;  %v773_v25 = vrot.slane %v2576_v19, 6  ;;  %v774_v31 = vrot.slane %v2573_v17, 7  ;;  %v744_v33 = vrot.slane %v2427_v1, 6  ;;  %v745_v37 = vrot.slane %v2549_v61, 6 }
  0x29   : > { %1269 = vrot.lane.b32.xlu0 %v2544_v58, %s2326_s28  ;;  %v1249_v23 = vsel %vm570_vm3, %v2568_v12, %v1248_v52  ;;  %v685_v40 = vsel %vm678_vm4, %v681_v21, %v2579_v22  ;;  %v866_v41 = vshll.u32 %v2561_v10, 16  ;;  %v870_v44 = vshrl.u32 %v2561_v10, 16 }
  0x2a   : > { %v939_v45 = vrot.slane %v2561_v10, 3  ;;  %v918_v47 = vsel %vm630_vm1, %v916_v24, %v917_v28  ;;  %v3453_v51 = vrot.slane %v2480_v26, 3  ;;  %v772_v52 = vor.u32 %v771_v30, %v770_v29 }
  0x2b   : > { %v2603_v55 = vor.u32 %v774_v31, %v773_v25  ;;  %v965_v56 = vrot.slane %v878_v35, 3  ;;  %v966_v59 = vrot.slane %v874_v34, 4  ;;  %v746_v60 = vsel %vm743_vm6, %v744_v33, %v745_v37 }
  0x2c   : > { %731 = vrot.lane.b32.xlu1 %v722_v11, %s2329_s10  ;;  %v962_v62 = vrot.slane %v870_v44, 3  ;;  %v963_v63 = vrot.slane %v866_v41, 4  ;;  %v820_v11 = vrot.slane %v2427_v1, 7  ;;  %v3448_v35 = vrot.slane %v2549_v61, 7 }
  0x2d   : > { %1275 = vrot.lane.b32.xlu0 %v1255_v20, %s2326_s28  ;;  %v776_v3 = vsel %vm3466_vm5, %v772_v52, %v2603_v55  ;;  %v941_v34 = vsel %vm654_vm0, %v939_v45, %v3453_v51  ;;  %v2622_v21 = vor.u32 %v966_v59, %v965_v56  ;;  %v585_v24 = vor.u32 %v583_v49, %v2505_v43  ;;  %v2233_v45 = vld [vmem:[%s2414_s12 + $0x28] ss:$0 sps:$4 sm:$0xff]   ;;  %v2234_v56 = vld [vmem:[%s2539_s8] ss:$0 sps:$4 sm:$0xff]  }
  0x2e   : > { %v964_v20 = vor.u32 %v963_v63, %v962_v62  ;;  %v3447_v29 = vrot.slane %v2517_v50, 1  ;;  %v861_v30 = vshll.u32 %v2558_v9, 16  ;;  %v1002_v31 = vrot.slane %v2561_v10, 4 }
  0x2f   : > { %v3446_v33 = vrot.slane %v2480_v26, 4  ;;  %v3443_v49 = vrot.slane %v2483_v27, 6  ;;  %v868_v59 = vrot.slane %v866_v41, 1  ;;  %v970_v0 = vrot.slane %v882_v38, 4 }
  0x30   : > { %1273 = vrot.lane.b32.xlu1 %v1249_v23, %s2326_s28  ;;  %v822_v23 = vsel %vm819_vm7, %v820_v11, %v3448_v35  ;;  %v968_v25 = vsel %vm678_vm4, %v964_v20, %v2622_v21  ;;  %v590_v43 = vsel %vm570_vm3, %v585_v24, %v3447_v29  ;;  %v863_v52 = vrot.slane %v861_v30, 1  ;;  %v2671_v24 = vld [vmem:[%s2539_s8 + $0xc] sm:$0xff]  }
  0x31   : > { %707 = vrot.lane.b32.xlu0 %v685_v40, %s2330_s11  ;;  %v1025_v40 = vrot.slane %v2480_v26, 6  ;;  %v872_v62 = vor.u32 %v870_v44, %v868_v59  ;;  %v2656_v11 = vsel %vm499_vm2, %v2233_v45, %v2234_v56  ;;  %v686_v20 = vrot.slane %v2576_v19, 3 }
  0x32   : > { %v687_v44 = vrot.slane %v2573_v17, 4  ;;  %v3449_v45 = vrot.slane %v2671_v24, 7  ;;  %v969_v56 = vrot.slane %v886_v39, 3  ;;  %v3444_v39 = vrot.slane %v2549_v61, 4 }
  0x33   : > { %v1027_v63 = vsel %vm743_vm6, %v1025_v40, %v3443_v49  ;;  %v2661_v41 = vsel %vm570_vm3, %v872_v62, %v2503_v42  ;;  %v2676_v42 = vld [vmem:[%s2539_s8 + $0x14] sm:$0x3f]   ;;  %v987_v40 = vrot.slane %v985_v46, 4  ;;  %v2718_v62 = vld [vmem:[%s2539_s8 + $0x4] sm:$0xff]   ;;  %v973_v38 = vrot.slane %v894_v14, 3  ;;  %s3487_s8 = smov 48  }
  0x34   : > { %927 = vrot.lane.b32.xlu1 %v918_v47, %s3462_s13  ;;  %v859_v47 = vshrl.u32 %v2558_v9, 16  ;;  %v3445_v14 = vrot.slane %v2573_v17, 1 }
  0x35   : > { %757 = vrot.lane.b32.xlu0 %v746_v60, %s3464_s14  ;;  %v1004_v60 = vsel %vm499_vm2, %v1002_v31, %v3446_v33  ;;  %v984_v31 = vrot.slane %v982_v48, 3 }
  0x37   : > { %v2692_v48 = vor.u32 %v987_v40, %v984_v31  ;;  %v2732_v31 = vor.u32 %v970_v0, %v969_v56  ;;  %v601_v56 = vor.u32 %v2576_v19, %v3445_v14  ;;  %v793_v14 = vshll.u32 %v2671_v24, 16 }
  0x38   : > { %807 = vrot.lane.b32.xlu1 %v776_v3, %s2333_s16  ;;  %v864_v3 = vor.u32 %v863_v52, %v859_v47  ;;  %v2690_v47 = vor.u32 %v687_v44, %v686_v20  ;;  %v831_v52 = vrot.slane %v2676_v42, 7 }
  0x39   : > { %950 = vrot.lane.b32.xlu0 %v941_v34, %s3460_s29  ;;  %v3442_v34 = vrot.slane %v2427_v1, 1 }
  0x3a   : > { %v869_v30 = vsel %vm570_vm3, %v864_v3, %v868_v59  ;;  %v2708_v59 = vld [vmem:[%s2414_s12 + $0x20] sm:$0xff]  }
  0x3b   : > { %v603_v3 = vshll.u32 %v2708_v59, 16 }
  0x3c   : > { %833 = vrot.lane.b32.xlu1 %v822_v23, %s2334_s17  ;;  %v2668_v23 = vshll.u32 %v2656_v11, 16 }
  0x3d   : > { %990 = vrot.lane.b32.xlu0 %v968_v25, %s2329_s10  ;;  %v3441_v25 = vrot.slane %v2549_v61, 3  ;;  %v605_v0 = vrot.slane %v603_v3, 1  ;;  %v691_v49 = vrot.slane %v603_v3, 4  ;;  %v778_v33 = vrot.slane %v603_v3, 7 }
  0x3e   : > { %v3450_v46 = vrot.slane %v2668_v23, 1  ;;  %v782_v44 = vrot.slane %v2668_v23, 7  ;;  %v695_v35 = vrot.slane %v2668_v23, 4  ;;  %v795_v3 = vrot.slane %v793_v14, 7 }
  0x3f   : > { %v2760_v19 = vsel %vm570_vm3, %v601_v56, %v605_v0  ;;  %v3468_v14 = vrot.slane %v2480_v26, 3 }
  0x40   : > { %619 = vrot.lane.b32.xlu1 %v590_v43, %s3456_s9  ;;  %v635_v43 = vsel %vm630_vm1, %v632_v5, %v3442_v34  ;;  %v659_v5 = vsel %vm654_vm0, %v656_v4, %v3441_v25  ;;  %v689_v4 = vsel %vm678_vm4, %v2579_v22, %v2690_v47  ;;  %v607_v22 = vshrl.u32 %v2708_v59, 16 }
  0x41   : > { %1013 = vrot.lane.b32.xlu0 %v1004_v60, %s2334_s17  ;;  %v2713_v60 = vsel %vm819_vm7, %v3449_v45, %v831_v52 }
  0x42   : > { %v690_v34 = vrot.slane %v607_v22, 3 }
  0x44   : > { %1038 = vrot.lane.b32.xlu1 %v1027_v63, %s2335_s18  ;;  %v974_v63 = vrot.slane %v890_v13, 4  ;;  %v3451_v13 = vrot.slane %v2708_v59, 6 }
  0x45   : > { %846 = vrot.lane.b32.xlu0 %v2558_v9, %s2336_s19  ;;  %v614_v9 = vshrl.u32 %v2656_v11, 16 }
  0x46   : > { %v975_v40 = vor.u32 %v974_v63, %v973_v38  ;;  %v724_v38 = vsel %vm499_vm2, %v721_v57, %v3444_v39  ;;  %v748_v57 = vsel %vm743_vm6, %v745_v37, %v3451_v13  ;;  %v3455_v37 = vrot.slane %v2656_v11, 6 }
  0x47   : > { %v781_v20 = vrot.slane %v614_v9, 6  ;;  %v694_v29 = vrot.slane %v614_v9, 3  ;;  %v751_v13 = vrot.slane %v2718_v62, 6  ;;  %v827_v63 = vrot.slane %v2718_v62, 7 }
  0x48   : > { %904 = vrot.lane.b32.xlu1 %v869_v30, %s3458_s30  ;;  %v616_v30 = vor.u32 %v614_v9, %v3450_v46  ;;  %v2744_v25 = vsel %vm678_vm4, %v2732_v31, %v975_v40  ;;  %v825_v9 = vrot.slane %v2656_v11, 7 }
  0x49   : > { %644 = vrot.lane.b32.xlu0 %v635_v43, %s3460_s29  ;;  %v3452_v43 = vrot.slane %v2480_v26, 1  ;;  %v2738_v52 = vor.u32 %v782_v44, %v781_v20  ;;  %v790_v20 = vshrl.u32 %v2671_v24, 16  ;;  %v3454_v44 = vrot.slane %v2656_v11, 1 }
  0x4b   : > { %v920_v39 = vsel %vm630_vm1, %v917_v28, %v3452_v43  ;;  %v792_v46 = vrot.slane %v790_v20, 6  ;;  %v2780_v28 = vor.u32 %v691_v49, %v690_v34  ;;  %v696_v43 = vor.u32 %v695_v35, %v694_v29 }
  0x4c   : > { %668 = vrot.lane.b32.xlu1 %v659_v5, %s2326_s28  ;;  %v699_v5 = vshrl.u32 %v2718_v62, 16  ;;  %v2786_v20 = vsel %vm743_vm6, %v3455_v37, %v751_v13  ;;  %v977_v35 = vrot.slane %v901_v7, 3  ;;  %v978_v29 = vrot.slane %v897_v18, 4 }
  0x4d   : > { %709 = vrot.lane.b32.xlu0 %v689_v4, %s2330_s11  ;;  %v702_v4 = vshll.u32 %v2718_v62, 16  ;;  %v3467_v34 = vrot.slane %v2483_v27, 3  ;;  %v664_v7 = vrot.slane %v2718_v62, 3 }
  0x4e   : > { %v701_v56 = vrot.slane %v699_v5, 3  ;;  %v785_v51 = vrot.slane %v699_v5, 6  ;;  %v979_v37 = vor.u32 %v978_v29, %v977_v35  ;;  %v3474_v35 = vrot.slane %v2573_v17, 1 }
  0x4f   : > { %v704_v45 = vrot.slane %v702_v4, 4  ;;  %v943_v5 = vsel %vm654_vm0, %v3468_v14, %v3467_v34  ;;  %v753_v34 = vrot.slane %v2671_v24, 6  ;;  %v1032_v29 = vrot.slane %v2494_v36, 6 }
  0x50   : > { %627 = vrot.lane.b32.xlu1 %v616_v30, %s3456_s9  ;;  %v777_v30 = vrot.slane %v607_v22, 6 }
  0x51   : > { %733 = vrot.lane.b32.xlu0 %v724_v38, %s2329_s10  ;;  %v786_v38 = vrot.slane %v702_v4, 7 }
  0x52   : > { %v2803_v4 = vor.u32 %v778_v33, %v777_v30  ;;  %v796_v33 = vor.u32 %v795_v3, %v792_v46  ;;  %v3469_v30 = vrot.slane %v2668_v23, 1  ;;  %v972_v46 = vsel %vm678_vm4, %v2622_v21, %v2732_v31 }
  0x53   : > { %v787_v49 = vor.u32 %v786_v38, %v785_v51  ;;  %v609_v51 = vor.u32 %v607_v22, %v605_v0  ;;  %v705_v38 = vor.u32 %v704_v45, %v701_v56  ;;  %v2833_v0 = vsel %vm743_vm6, %v751_v13, %v753_v34 }
  0x54   : > { %652 = vrot.lane.b32.xlu1 %v3454_v44, %s3460_s29  ;;  %v2792_v44 = vsel %vm678_vm4, %v2780_v28, %v696_v43  ;;  %v780_v22 = vsel %vm3466_vm5, %v2603_v55, %v2803_v4  ;;  %v3470_v55 = vrot.slane %v2671_v24, 7  ;;  %v3471_v56 = vrot.slane %v2549_v61, 7 }
  0x55   : > { %759 = vrot.lane.b32.xlu0 %v748_v57, %s3464_s14  ;;  %v2808_v57 = vsel %vm819_vm7, %v825_v9, %v827_v63  ;;  %v2814_v18 = vsel %vm3466_vm5, %v2738_v52, %v787_v49  ;;  %v2820_v14 = vsel %vm570_vm3, %v609_v51, %v3469_v30  ;;  %v2827_v45 = vsel %vm678_vm4, %v696_v43, %v705_v38 }
  0x56   : > { %v2836_v23 = vsel %vm3466_vm5, %v787_v49, %v796_v33  ;;  %v2849_v13 = vsel %vm819_vm7, %v827_v63, %v3470_v55  ;;  %v1005_v43 = vrot.slane %v2483_v27, 4  ;;  %v3472_v21 = vrot.slane %v2517_v50, 1 }
  0x57   : > { %v2863_v24 = vsel %vm678_vm4, %v979_v37, %v2692_v48  ;;  %v3473_v63 = vrot.slane %v2480_v26, 4  ;;  %v636_v51 = vrot.slane %v2549_v61, 1  ;;  %v802_v55 = vshll.u32 %v2676_v42, 16 }
  0x58   : > { %929 = vrot.lane.b32.xlu1 %v920_v39, %s3462_s13  ;;  %v2824_v39 = vsel %vm678_vm4, %v975_v40, %v979_v37  ;;  %v823_v40 = vrot.slane %v2708_v59, 7  ;;  %v593_v31 = vor.u32 %v2525_v53, %v3472_v21  ;;  %v729_v53 = vrot.slane %v2718_v62, 4 }
  0x59   : > { %952 = vrot.lane.b32.xlu0 %v943_v5, %s3460_s29  ;;  %v1006_v49 = vsel %vm499_vm2, %v3473_v63, %v1005_v43  ;;  %v1034_v37 = vrot.slane %v2448_v8, 6  ;;  %v1028_v5 = vrot.slane %v2444_v6, 6  ;;  %v804_v63 = vrot.slane %v802_v55, 7 }
  0x5a   : > { %v824_v3 = vsel %vm819_vm7, %v3471_v56, %v823_v40  ;;  %v598_v50 = vsel %vm570_vm3, %v593_v31, %v3474_v35  ;;  %v3476_v56 = vrot.slane %v2427_v1, 1  ;;  %v948_v1 = vrot.slane %v2494_v36, 3 }
  0x5b   : > { %v2886_v17 = vsel %vm743_vm6, %v1032_v29, %v1034_v37  ;;  %v3477_v35 = vrot.slane %v2549_v61, 3  ;;  %v725_v55 = vrot.slane %v2708_v59, 4  ;;  %vm1235_vm3 = vcmask 719872  }
  0x5c   : > { %676 = vrot.lane.b32.xlu1 %v664_v7, %s2326_s28 }
  0x5d   : > { %809 = vrot.lane.b32.xlu0 %v780_v22, %s2333_s16  ;;  %v755_v22 = vrot.slane %v2676_v42, 6 }
  0x5f   : > { %v756_v21 = vsel %vm743_vm6, %v753_v34, %v755_v22  ;;  %v2242_v22 = vld [vmem:[%s3438_s4 + $0x8] sm:$0xff]  }
  0x60   : > { %992 = vrot.lane.b32.xlu1 %v972_v46, %s2329_s10  ;;  %v799_v46 = vshrl.u32 %v2676_v42, 16  ;;  %v925_v42 = vrot.slane %v2463_v15, 1 }
  0x61   : > { %717 = vrot.lane.b32.xlu0 %v705_v38, %s2330_s11  ;;  %v3475_v38 = vrot.slane %v2483_v27, 6 }
  0x62   : > { %v801_v31 = vrot.slane %v799_v46, 6  ;;  %v1011_v46 = vrot.slane %v2494_v36, 4 }
  0x63   : > { %v1029_v30 = vsel %vm743_vm6, %v3475_v38, %v1028_v5  ;;  %v2240_v38 = vld [vmem:[%s3438_s4] sm:$0xff]  }
  0x64   : > { %835 = vrot.lane.b32.xlu1 %v824_v3, %s2334_s17  ;;  %v637_v3 = vsel %vm630_vm1, %v3476_v56, %v636_v51  ;;  %v2245_v56 = vld [vmem:[%s3438_s4 + $0x58] sm:$0xff]  }
  0x65   : > { %1015 = vrot.lane.b32.xlu0 %v1006_v49, %s2334_s17  ;;  %v805_v49 = vor.u32 %v804_v63, %v801_v31  ;;  %v1036_v31 = vrot.slane %v2466_v16, 6  ;;  %v3480_v63 = vrot.slane %v2708_v59, 6 }
  0x67   : > { %v806_v34 = vsel %vm3466_vm5, %v796_v33, %v805_v49  ;;  %v693_v33 = vsel %vm678_vm4, %v2690_v47, %v2780_v28  ;;  %v2243_v47 = vld [vmem:[%s3438_s4 + $0x50] sm:$0xff]   ;;  %vm1154_vm4 = vcmask 588800  }
  0x68   : > { %621 = vrot.lane.b32.xlu1 %v598_v50, %s3456_s9  ;;  %v2239_v50 = vld [vmem:[%s3438_s4 + $0x40] sm:$0xff]   ;;  %v2244_v28 = vld [vmem:[%s3438_s4 + $0x10] sm:$0xff]  }
  0x69   : > { %741 = vrot.lane.b32.xlu0 %v729_v53, %s2329_s10  ;;  %2069 = vmatprep.subr.bf16.mxu0 %v2239_v50 }
  0x6a   : > { %2145 = vmatprep.subr.bf16.mxu1 %v2239_v50  ;;  %2070 = vmatpush3.bf16.msra.mxu0 %v2240_v38  ;;  %v2248_v50 = vld [vmem:[%s3438_s4 + $0x20] sm:$0xff]  }
  0x6b   : > { %2153 = vmatpush3.bf16.msra.mxu1 %v2240_v38  ;;  %v3481_v38 = vrot.slane %v2480_v26, 1 }
  0x6c   : > { %848 = vrot.lane.b32.xlu1 %v2561_v10, %s2336_s19  ;;  %v660_v10 = vrot.slane %v2708_v59, 3 }
  0x6d   : > { %1040 = vrot.lane.b32.xlu0 %v1029_v30, %s2335_s18  ;;  %v2241_v30 = vld [vmem:[%s3438_s4 + $0x48] sm:$0xff]  }
  0x6e   : > { %2071 = vmatprep.subr.bf16.mxu0 %v2241_v30  ;;  %2146 = vmatprep.subr.bf16.mxu1 %v2241_v30  ;;  %v2249_v30 = vld [vmem:[%s3438_s4 + $0x68] sm:$0xff]  }
  0x6f   : > { %2072 = vmatpush3.bf16.msra.mxu0 %v2242_v22  ;;  %2154 = vmatpush3.bf16.msra.mxu1 %v2242_v22  ;;  %v2250_v22 = vld [vmem:[%s3438_s4 + $0x28] sm:$0xff]  }
  0x70   : > { %646 = vrot.lane.b32.xlu1 %v637_v3, %s3460_s29  ;;  %2073 = vmatprep.subr.bf16.mxu0 %v2243_v47  ;;  %v3478_v3 = vrot.slane %v2549_v61, 4 }
  0x71   : > { %767 = vrot.lane.b32.xlu0 %v756_v21, %s3464_s14  ;;  %2147 = vmatprep.subr.bf16.mxu1 %v2243_v47  ;;  %v944_v47 = vrot.slane %v2444_v6, 3 }
  0x72   : > { %v726_v21 = vsel %vm499_vm2, %v3478_v3, %v725_v55  ;;  %v2252_v3 = vld [vmem:[%s3438_s4 + $0x30] sm:$0xff]  }
  0x73   : > { %2074 = vmatpush3.bf16.msra.mxu0 %v2244_v28  ;;  %2155 = vmatpush3.bf16.msra.mxu1 %v2244_v28 }
  0x74   : > { %906 = vrot.lane.b32.xlu1 %v2661_v41, %s3458_s30  ;;  %v661_v41 = vsel %vm654_vm0, %v3477_v35, %v660_v10  ;;  %2075 = vmatprep.subr.bf16.mxu0 %v2245_v56  ;;  %v2247_v35 = vld [vmem:[%s3438_s4 + $0x60] sm:$0xff]   ;;  %s3483_s30 = smov 96  }
  0x75   : > { %937 = vrot.lane.b32.xlu0 %v925_v42, %s3462_s13  ;;  %2148 = vmatprep.subr.bf16.mxu1 %v2245_v56  ;;  %v1007_v56 = vrot.slane %v2444_v6, 4  ;;  %s2338_s13 = smov 112  }
  0x78   : > { %960 = vrot.lane.b32.xlu1 %v948_v1, %s3460_s29  ;;  %s3485_s29 = smov 16  }
  0x79   : > { %817 = vrot.lane.b32.xlu0 %v806_v34, %s2333_s16  ;;  %v921_v34 = vrot.slane %v2483_v27, 1 }
  0x7c   : > { %670 = vrot.lane.b32.xlu1 %v661_v41, %s2326_s28  ;;  %v1037_v41 = vsel %vm743_vm6, %v1034_v37, %v1036_v31 }
  0x7d   : > { %711 = vrot.lane.b32.xlu0 %v693_v33, %s2330_s11  ;;  %v922_v33 = vsel %vm630_vm1, %v3481_v38, %v921_v34 }
  0x80   : > { %1000 = vrot.lane.b32.xlu1 %v2692_v48, %s2329_s10  ;;  %v2246_v48 = vld [vmem:[%s3438_s4 + $0x18] sm:$0xff]  }
  0x81   : > { %1023 = vrot.lane.b32.xlu0 %v1011_v46, %s2334_s17  ;;  %2076 = vmatpush3.bf16.msra.mxu0 %v2246_v48 }
  0x82   : > { %2077 = vmatprep.subr.bf16.mxu0 %v2247_v35  ;;  %2156 = vmatpush3.bf16.msra.mxu1 %v2246_v48  ;;  %v2251_v48 = vld [vmem:[%s3438_s4 + $0x70] sm:$0xff]  }
  0x83   : > { %2149 = vmatprep.subr.bf16.mxu1 %v2247_v35  ;;  %v2254_v35 = vld [vmem:[%s3438_s4 + $0x38] sm:$0xff]  }
  0x84   : > { %843 = vrot.lane.b32.xlu1 %v2713_v60, %s2334_s17  ;;  %v3479_v60 = vrot.slane %v2656_v11, 6 }
  0x85   : > { %856 = vrot.lane.b32.xlu0 %v2463_v15, %s2336_s19  ;;  %2078 = vmatpush3.bf16.msra.mxu0 %v2248_v50 }
  0x86   : > { %v750_v49 = vsel %vm743_vm6, %v3480_v63, %v3479_v60  ;;  %2079 = vmatprep.subr.bf16.mxu0 %v2249_v30  ;;  %2157 = vmatpush3.bf16.msra.mxu1 %v2248_v50  ;;  %v2253_v63 = vld [vmem:[%s3438_s4 + $0x78] sm:$0xff]  }
  0x87   : > { %2150 = vmatprep.subr.bf16.mxu1 %v2249_v30 }
  0x88   : > { %735 = vrot.lane.b32.xlu1 %v726_v21, %s2329_s10  ;;  %v3484_v21 = vrot.slane %v2483_v27, 3 }
  0x89   : > { %761 = vrot.lane.b32.xlu0 %v750_v49, %s3464_s14  ;;  %2080 = vmatpush3.bf16.msra.mxu0 %v2250_v22  ;;  %s3486_s14 = smov 8  }
  0x8a   : > { %v945_v31 = vsel %vm654_vm0, %v3484_v21, %v944_v47  ;;  %2081 = vmatprep.subr.bf16.mxu0 %v2251_v48  ;;  %2158 = vmatpush3.bf16.msra.mxu1 %v2250_v22  ;;  %v1030_v21 = vrot.slane %v2463_v15, 6 }
  0x8b   : > { %2151 = vmatprep.subr.bf16.mxu1 %v2251_v48 }
  0x8c   : > { %1048 = vrot.lane.b32.xlu1 %v1037_v41, %s2335_s18  ;;  %v3001_v37 = vpop.permute.xlu1 %666  ;;  %v3008_v28 = vpop.permute.xlu0 %642 }
  0x8d   : > { %931 = vrot.lane.b32.xlu0 %v922_v33, %s3482_s7  ;;  %2082 = vmatpush3.bf16.msra.mxu0 %v2252_v3 }
  0x8e   : > { %2083 = vmatprep.subr.bf16.mxu0 %v2253_v63  ;;  %2159 = vmatpush3.bf16.msra.mxu1 %v2252_v3 }
  0x8f   : > { %2152 = vmatprep.subr.bf16.mxu1 %v2253_v63 }
  0x90   : > { %914 = vrot.lane.b32.xlu1 %v2568_v12, %s3483_s30  ;;  %v1008_v12 = vsel %vm499_vm2, %v1005_v43, %v1007_v56  ;;  %v638_v43 = vrot.slane %v2708_v59, 1 }
  0x91   : > { %994 = vrot.lane.b32.xlu0 %v2744_v25, %s2329_s10  ;;  %v784_v25 = vsel %vm3466_vm5, %v2803_v4, %v2738_v52  ;;  %2084 = vmatpush3.bf16.msra.mxu0 %v2254_v35  ;;  %v826_v52 = vsel %vm819_vm7, %v823_v40, %v825_v9  ;;  %vm1167_vm7 = vcmask 785408  }
  0x92   : > { %v1272_v60 = vpop.permute.xlu1 %1271  ;;  %2160 = vmatpush3.bf16.msra.mxu1 %v2254_v35  ;;  %v639_v48 = vsel %vm630_vm1, %v636_v51, %v638_v43 }
  0x93   : > { %v1280_v49 = vpop.permute.xlu0 %1279  ;;  %v1286_v4 = vsel %vm1076_vm8, %v2444_v6, %v1272_v60 }
  0x94   : > { %954 = vrot.lane.b32.xlu1 %v945_v31, %s3485_s29  ;;  %v1310_v9 = vshrl.u32 %v1286_v4, 16  ;;  %v1313_v31 = vshll.u32 %v1286_v4, 16  ;;  %v1294_v63 = vsel %vm1076_vm8, %v2466_v16, %v1280_v49  ;;  %v1031_v16 = vsel %vm743_vm6, %v1028_v5, %v1030_v21  ;;  %v3085_v49 = vld [vmem:[%s3438_s4 + $0x80] sm:$0xff]  }
  0x95   : > { %1017 = vrot.lane.b32.xlu0 %v1008_v12, %s2334_s17  ;;  %2129 = vmatprep.subr.bf16.mxu1 %v3085_v49 }
  0x96   : > { %v1278_v41 = vpop.permute.xlu1 %1277  ;;  %v1312_v4 = vrot.slane %v1310_v9, 6  ;;  %v662_v9 = vrot.slane %v2656_v11, 3 }
  0x97   : > { %v1268_v50 = vpop.permute.xlu0 %1267  ;;  %v1292_v40 = vsel %vm1076_vm8, %v2448_v8, %v1278_v41 }
  0x98   : > { %811 = vrot.lane.b32.xlu1 %v784_v25, %s2333_s16  ;;  %v1282_v38 = vsel %vm1076_vm8, %v2480_v26, %v1268_v50  ;;  %v1334_v8 = vshrl.u32 %v1292_v40, 16  ;;  %v1337_v41 = vshll.u32 %v1292_v40, 16 }
  0x99   : > { %850 = vrot.lane.b32.xlu0 %v2480_v26, %s2336_s19  ;;  %v1295_v30 = vshrl.u32 %v1282_v38, 16  ;;  %v1298_v22 = vshll.u32 %v1282_v38, 16 }
  0x9a   : > { %v618_v33 = vpop.permute.xlu1 %617  ;;  %v1336_v40 = vrot.slane %v1334_v8, 6  ;;  %v1339_v5 = vrot.slane %v1337_v41, 7 }
  0x9b   : > { %v1270_v3 = vpop.permute.xlu0 %1269  ;;  %v1052_v61 = vsel %vm1050_vm9, %v2431_v2, %v618_v33  ;;  %v1297_v35 = vrot.slane %v1295_v30, 6  ;;  %v1300_v25 = vrot.slane %v1298_v22, 7  ;;  %v1315_v33 = vrot.slane %v1313_v31, 7 }
  0x9c   : > { %837 = vrot.lane.b32.xlu1 %v826_v52, %s2334_s17  ;;  %v1284_v26 = vsel %vm1076_vm8, %v2483_v27, %v1270_v3  ;;  %v1065_v2 = vsel %vm1063_vm10, %v1052_v61, %v3008_v28  ;;  %v946_v27 = vrot.slane %v2463_v15, 3 }
  0x9d   : > { %v1302_v60 = vshrl.u32 %v1284_v26, 16  ;;  %v1305_v12 = vshll.u32 %v1284_v26, 16  ;;  %648 = vrot.lane.b32.xlu0 %v639_v48, %s3485_s29  ;;  %v1345_v48 = vshll.u32 %v1294_v63, 16  ;;  %v1301_v28 = vor.u32 %v1300_v25, %v1297_v35 }
  0x9e   : > { %v732_v51 = vpop.permute.xlu1 %731  ;;  %v1316_v8 = vor.u32 %v1315_v33, %v1312_v4 }
  0x9f   : > { %v1304_v50 = vrot.slane %v1302_v60, 6  ;;  %v1307_v38 = vrot.slane %v1305_v12, 7  ;;  %v3071_v52 = vpop.permute.xlu0 %1275  ;;  %v1078_v60 = vsel %vm1076_vm8, %v1065_v2, %v3001_v37  ;;  %v1347_v37 = vrot.slane %v1345_v48, 7 }
  0xa0   : > { %623 = vrot.lane.b32.xlu1 %v2760_v19, %s3486_s14  ;;  %v1342_v19 = vshrl.u32 %v1294_v63, 16  ;;  %v663_v2 = vsel %vm654_vm0, %v660_v10, %v662_v9 }
  0xa1   : > { %v1308_v30 = vor.u32 %v1307_v38, %v1304_v50  ;;  %v3098_v50 = vor.u32 %v1339_v5, %v1336_v40 }
  0xa2   : > { %v1274_v22 = vpop.permute.xlu1 %1273  ;;  %v1344_v41 = vrot.slane %v1342_v19, 6 }
  0xa3   : > { %v1288_v3 = vsel %vm1076_vm8, %v2463_v15, %v1274_v22  ;;  %v708_v26 = vpop.permute.xlu0 %707  ;;  %v1309_v63 = vsel %vm3466_vm5, %v1301_v28, %v1308_v30  ;;  %v1317_v22 = vsel %vm3466_vm5, %v1308_v30, %v1316_v8 }
  0xa4   : > { %1042 = vrot.lane.b32.xlu1 %v1031_v16, %s2335_s18  ;;  %v1091_v31 = vsel %vm1089_vm11, %v1078_v60, %v708_v26  ;;  %v1318_v12 = vshrl.u32 %v1288_v3, 16  ;;  %v1321_v61 = vshll.u32 %v1288_v3, 16  ;;  %1350 = vrot.lane.b32.xlu0 %v1309_v63, %s2338_s13  ;;  %v1348_v48 = vor.u32 %v1347_v37, %v1344_v41  ;;  %v3114_v3 = vld [vmem:[%s2419_s15 + $0x20] sm:$0xff]  }
  0xa5   : > { %v1104_v35 = vsel %vm1102_vm12, %v1091_v31, %v732_v51  ;;  %v727_v51 = vrot.slane %v2656_v11, 4  ;;  %v923_v10 = vrot.slane %v3114_v3, 1 }
  0xa6   : > { %v928_v25 = vpop.permute.xlu1 %927  ;;  %v1320_v16 = vrot.slane %v1318_v12, 6  ;;  %v1323_v4 = vrot.slane %v1321_v61, 7  ;;  %v1349_v30 = vsel %vm3466_vm5, %v3098_v50, %v1348_v48 }
  0xa7   : > { %v758_v38 = vpop.permute.xlu0 %757  ;;  %v728_v26 = vsel %vm499_vm2, %v725_v55, %v727_v51 }
  0xa8   : > { %908 = vrot.lane.b32.xlu1 %v2528_v54, %s3483_s30  ;;  %v1117_v33 = vsel %vm1115_vm13, %v1104_v35, %v758_v38  ;;  %1352 = vrot.lane.b32.xlu0 %v1317_v22, %s2338_s13  ;;  %v3117_v40 = vor.u32 %v1323_v4, %v1320_v16  ;;  %v924_v35 = vsel %vm630_vm1, %v921_v34, %v923_v10  ;;  %v2280_v16 = vld [vmem:[%s2414_s12 + $0x8] sm:$0xff]  }
  0xa9   : > { %v947_v22 = vsel %vm654_vm0, %v944_v47, %v946_v27 }
  0xaa   : > { %v808_v19 = vpop.permute.xlu1 %807  ;;  %v1325_v63 = vsel %vm3466_vm5, %v1316_v8, %v3117_v40  ;;  %vm1180_vm5 = vcmask 982016  }
  0xab   : > { %v1130_v54 = vsel %vm1128_vm14, %v1117_v33, %v808_v19  ;;  %v951_v28 = vpop.permute.xlu0 %950 }
  0xac   : > { %672 = vrot.lane.b32.xlu1 %v663_v2, %s2326_s28  ;;  %v1200_v5 = vsel %vm1063_vm10, %v928_v25, %v951_v28  ;;  %1360 = vrot.lane.b32.xlu0 %v1349_v30, %s2338_s13  ;;  %v1009_v28 = vrot.slane %v2463_v15, 4 }
  0xae   : > { %v834_v60 = vpop.permute.xlu1 %833  ;;  %v1010_v30 = vsel %vm499_vm2, %v1007_v56, %v1009_v28 }
  0xaf   : > { %v1143_v31 = vsel %vm1141_vm15, %v1130_v54, %v834_v60  ;;  %v991_v12 = vpop.permute.xlu0 %990 }
  0xb0   : > { %737 = vrot.lane.b32.xlu1 %v728_v26, %s2329_s10  ;;  %v1212_v61 = vsel %vm1102_vm12, %v1200_v5, %v991_v12  ;;  %1354 = vrot.lane.b32.xlu0 %v1325_v63, %s2338_s13  ;;  %v2282_v63 = vld [vmem:[%s2419_s15 + $0x18] sm:$0xff]  }
  0xb2   : > { %v620_v55 = vpop.permute.xlu1 %619 }
  0xb3   : > { %v1014_v41 = vpop.permute.xlu0 %1013  ;;  %v1054_v4 = vsel %vm1050_vm9, %v2280_v16, %v620_v55 }
  0xb4   : > { %933 = vrot.lane.b32.xlu1 %v924_v35, %s3482_s7  ;;  %v1224_v37 = vsel %vm1141_vm15, %v1212_v61, %v1014_v41  ;;  %713 = vrot.lane.b32.xlu0 %v2792_v44, %s2330_s11  ;;  %v665_v61 = vsel %vm654_vm0, %v662_v9, %v664_v7  ;;  %v730_v7 = vsel %vm499_vm2, %v727_v51, %v729_v53 }
  0xb6   : > { %v1039_v8 = vpop.permute.xlu1 %1038 }
  0xb7   : > { %v3144_v38 = vsel %vm1235_vm3, %v1224_v37, %v1039_v8  ;;  %v847_v34 = vpop.permute.xlu0 %846  ;;  %v3488_v37 = vrot.slane %v2656_v11, 1 }
  0xb8   : > { %813 = vrot.lane.b32.xlu1 %v2814_v18, %s2333_s16  ;;  %v1156_v2 = vsel %vm1154_vm4, %v1143_v31, %v847_v34  ;;  %763 = vrot.lane.b32.xlu0 %v2786_v20, %s3487_s8 }
  0xba   : > { %v905_v44 = vpop.permute.xlu1 %904 }
  0xbb   : > { %v1169_v33 = vsel %vm1167_vm7, %v1156_v2, %v905_v44  ;;  %v645_v18 = vpop.permute.xlu0 %644 }
  0xbc   : > { %839 = vrot.lane.b32.xlu1 %v2808_v57, %s2334_s17  ;;  %v3163_v19 = vsel %vm1180_vm5, %v1169_v33, %v928_v25  ;;  %v1067_v48 = vsel %vm1063_vm10, %v1054_v4, %v645_v18  ;;  %956 = vrot.lane.b32.xlu0 %v947_v22, %s3485_s29  ;;  %v1033_v57 = vsel %vm743_vm6, %v1030_v21, %v1032_v29  ;;  %vm3489_vm6 = vsmask.f32 1280 }
  0xbe   : > { %v669_v20 = vpop.permute.xlu1 %668 }
  0xbf   : > { %v1080_v54 = vsel %vm1076_vm8, %v1067_v48, %v669_v20  ;;  %v710_v5 = vpop.permute.xlu0 %709 }
  0xc0   : > { %625 = vrot.lane.b32.xlu1 %v2820_v14, %s3486_s14  ;;  %v1093_v47 = vsel %vm1089_vm11, %v1080_v54, %v710_v5  ;;  %996 = vrot.lane.b32.xlu0 %v2824_v39, %s2329_s10  ;;  %v2281_v14 = vld [vmem:[%s2438_s20 + $0x4] sm:$0xff]  }
  0xc1   : > { %v1290_v26 = vsel %vm1076_vm8, %v2281_v14, %v3071_v52 }
  0xc2   : > { %v628_v25 = vpop.permute.xlu1 %627  ;;  %v1326_v21 = vshrl.u32 %v1290_v26, 16  ;;  %v1329_v6 = vshll.u32 %v1290_v26, 16 }
  0xc3   : > { %v734_v60 = vpop.permute.xlu0 %733  ;;  %v1062_v31 = vsel %vm1050_vm9, %v2656_v11, %v628_v25  ;;  %v926_v11 = vsel %vm630_vm1, %v923_v10, %v925_v42  ;;  %v949_v10 = vsel %vm654_vm0, %v946_v27, %v948_v1  ;;  %vm3490_vm0 = vmmov %vm3489_vm6 }
  0xc4   : > { %1044 = vrot.lane.b32.xlu1 %v1033_v57, %s2335_s18  ;;  %v1106_v39 = vsel %vm1102_vm12, %v1093_v47, %v734_v60  ;;  %1019 = vrot.lane.b32.xlu0 %v1010_v30, %s2334_s17  ;;  %v1328_v55 = vrot.slane %v1326_v21, 6  ;;  %v1331_v41 = vrot.slane %v1329_v6, 7 }
  0xc6   : > { %v653_v29 = vpop.permute.xlu1 %652  ;;  %v1332_v2 = vor.u32 %v1331_v41, %v1328_v55 }
  0xc7   : > { %v1075_v56 = vsel %vm1063_vm10, %v1062_v31, %v653_v29  ;;  %v760_v12 = vpop.permute.xlu0 %759 }
  0xc8   : > { %910 = vrot.lane.b32.xlu1 %v2544_v58, %s3483_s30  ;;  %v1119_v52 = vsel %vm1115_vm13, %v1106_v39, %v760_v12  ;;  %852 = vrot.lane.b32.xlu0 %v2282_v63, %s2336_s19  ;;  %v641_v58 = vsel %vm630_vm1, %v638_v43, %v3488_v37  ;;  %v1333_v4 = vsel %vm3489_vm6, %v3117_v40, %v1332_v2  ;;  %vm1362_vm1 = vcmask 916480  }
  0xca   : > { %v930_v35 = vpop.permute.xlu1 %929 }
  0xcb   : > { %v953_v8 = vpop.permute.xlu0 %952 }
  0xcc   : > { %674 = vrot.lane.b32.xlu1 %v665_v61, %s2326_s28  ;;  %v3210_v34 = vsel %vm1063_vm10, %v930_v35, %v953_v8  ;;  %650 = vrot.lane.b32.xlu0 %v641_v58, %s3485_s29 }
  0xce   : > { %v677_v9 = vpop.permute.xlu1 %676 }
  0xcf   : > { %v1088_v59 = vsel %vm1076_vm8, %v1075_v56, %v677_v9  ;;  %v810_v16 = vpop.permute.xlu0 %809  ;;  %v2283_v56 = vld [vmem:[%s2414_s12 + $0x10] sm:$0xff]  }
  0xd0   : > { %739 = vrot.lane.b32.xlu1 %v730_v7, %s2329_s10  ;;  %v1132_v43 = vsel %vm1128_vm14, %v1119_v52, %v810_v16  ;;  %1356 = vrot.lane.b32.xlu0 %v1333_v4, %s2338_s13 }
  0xd2   : > { %v3229_v62 = vpop.permute.xlu1 %992 }
  0xd3   : > { %v718_v53 = vpop.permute.xlu0 %717  ;;  %v1214_v37 = vsel %vm1102_vm12, %v3210_v34, %v3229_v62 }
  0xd4   : > { %935 = vrot.lane.b32.xlu1 %v926_v11, %s3482_s7  ;;  %v1101_v51 = vsel %vm1089_vm11, %v1088_v59, %v718_v53  ;;  %715 = vrot.lane.b32.xlu0 %v2827_v45, %s2330_s11  ;;  %s2165_s11 = smul.u32 44, %s3502_s22 }
  0xd6   : > { %v836_v44 = vpop.permute.xlu1 %835 }
  0xd7   : > { %v1016_v40 = vpop.permute.xlu0 %1015 }
  0xd8   : > { %815 = vrot.lane.b32.xlu1 %v2836_v23, %s2333_s16  ;;  %765 = vrot.lane.b32.xlu0 %v2833_v0, %s3487_s8  ;;  %v1012_v23 = vsel %vm499_vm2, %v1009_v28, %v1011_v46  ;;  %v1226_v9 = vsel %vm1141_vm15, %v1214_v37, %v1016_v40 }
  0xda   : > { %v622_v42 = vpop.permute.xlu1 %621 }
  0xdb   : > { %v742_v33 = vpop.permute.xlu0 %741  ;;  %v1056_v12 = vsel %vm1050_vm9, %v2283_v56, %v622_v42 }
  0xdc   : > { %841 = vrot.lane.b32.xlu1 %v2849_v13, %s2334_s17  ;;  %958 = vrot.lane.b32.xlu0 %v949_v10, %s3485_s29  ;;  %v1145_v13 = vsel %vm1141_vm15, %v1132_v43, %v836_v44  ;;  %v1114_v61 = vsel %vm1102_vm12, %v1101_v51, %v742_v33 }
  0xde   : > { %v849_v45 = vpop.permute.xlu1 %848 }
  0xdf   : > { %v1041_v22 = vpop.permute.xlu0 %1040  ;;  %v1158_v27 = vsel %vm1154_vm4, %v1145_v13, %v849_v45 }
  0xe0   : > { %854 = vrot.lane.b32.xlu1 %v3114_v3, %s2336_s19  ;;  %998 = vrot.lane.b32.xlu0 %v2863_v24, %s2329_s10  ;;  %s2164_s10 = smul.u32 11, %s3506_s21 }
  0xe2   : > { %v647_v0 = vpop.permute.xlu1 %646  ;;  %s431_s16 = sadd.s32 %s2165_s11, %s2164_s10 }
  0xe3   : > { %v768_v1 = vpop.permute.xlu0 %767  ;;  %v1069_v55 = vsel %vm1063_vm10, %v1056_v12, %v647_v0 }
  0xe4   : > { %912 = vrot.lane.b32.xlu1 %v2489_v32, %s3483_s30  ;;  %1021 = vrot.lane.b32.xlu0 %v1012_v23, %s2334_s17  ;;  %v1341_v32 = vsel %vm3490_vm0, %v1332_v2, %v3098_v50  ;;  %s1988_s17 = sshll.u32 %s431_s16, 2 }
  0xe5   : > { %s3387_s7 = scalar_lea.vmem %s3440_s6, %s1988_s17 }
  0xe6   : > { %v907_v3 = vpop.permute.xlu1 %906 }
  0xe7   : > { %v1171_v24 = vsel %vm1167_vm7, %v1158_v27, %v907_v3  ;;  %v3262_v18 = vpop.permute.xlu0 %937 }
  0xe8   : > { %v3265_v36 = vsel %vm1180_vm5, %v1171_v24, %v930_v35  ;;  %1046 = vrot.lane.b32.xlu0 %v2886_v17, %s2335_s18  ;;  %v1127_v35 = vsel %vm1115_vm13, %v1114_v61, %v768_v1 }
  0xea   : > { %v961_v15 = vpop.permute.xlu1 %960 }
  0xeb   : > { %v818_v46 = vpop.permute.xlu0 %817  ;;  %v1210_v2 = vsel %vm1063_vm10, %v3262_v18, %v961_v15 }
  0xec   : > { %1358 = vrot.lane.b32.xlu0 %v1341_v32, %s2338_s13  ;;  %v1140_v58 = vsel %vm1128_vm14, %v1127_v35, %v818_v46 }
  0xee   : > { %v671_v48 = vpop.permute.xlu1 %670 }
  0xef   : > { %v712_v20 = vpop.permute.xlu0 %711  ;;  %v1082_v8 = vsel %vm1076_vm8, %v1069_v55, %v671_v48 }
  0xf0   : > { %v1095_v43 = vsel %vm1089_vm11, %v1082_v8, %v712_v20 }
  0xf2   : > { %v1001_v54 = vpop.permute.xlu1 %1000 }
  0xf3   : > { %v1024_v28 = vpop.permute.xlu0 %1023  ;;  %v1222_v16 = vsel %vm1102_vm12, %v1210_v2, %v1001_v54 }
  0xf6   : > { %v844_v5 = vpop.permute.xlu1 %843 }
  0xf7   : > { %v857_v47 = vpop.permute.xlu0 %856  ;;  %v1153_v59 = vsel %vm1141_vm15, %v1140_v58, %v844_v5  ;;  %v2284_v5 = vld [vmem:[%s2414_s12 + $0x18] sm:$0xff]  }
  0xf8   : > { %v1166_v62 = vsel %vm1154_vm4, %v1153_v59, %v857_v47 }
  0xfa   : > { %v736_v57 = vpop.permute.xlu1 %735 }
  0xfb   : > { %v762_v25 = vpop.permute.xlu0 %761  ;;  %v1108_v53 = vsel %vm1102_vm12, %v1095_v43, %v736_v57 }
  0xfc   : > { %v1121_v33 = vsel %vm1115_vm13, %v1108_v53, %v762_v25 }
  0xfe   : > { %v1049_v30 = vpop.permute.xlu1 %1048 }
  0xff   : > { %v3272_v14 = vpop.permute.xlu0 %931 }
 0x102   : > { %v915_v17 = vpop.permute.xlu1 %914 }
 0x103   : > { %v995_v26 = vpop.permute.xlu0 %994  ;;  %v1179_v44 = vsel %vm1167_vm7, %v1166_v62, %v915_v17 }
 0x104   : > { %v1197_v23 = vsel %vm1180_vm5, %v1179_v44, %v3262_v18 }
 0x106   : > { %v955_v60 = vpop.permute.xlu1 %954 }
 0x107   : > { %v1018_v31 = vpop.permute.xlu0 %1017  ;;  %v1204_v4 = vsel %vm1063_vm10, %v3272_v14, %v955_v60 }
 0x108   : > { %v1216_v42 = vsel %vm1102_vm12, %v1204_v4, %v995_v26 }
 0x109   : > { %v1228_v13 = vsel %vm1141_vm15, %v1216_v42, %v1018_v31 }
 0x10a   : > { %v812_v39 = vpop.permute.xlu1 %811 }
 0x10b   : > { %v851_v50 = vpop.permute.xlu0 %850  ;;  %v1134_v0 = vsel %vm1128_vm14, %v1121_v33, %v812_v39 }
 0x10e   : > { %v838_v29 = vpop.permute.xlu1 %837 }
 0x10f   : > { %v3274_v21 = vpop.permute.xlu0 %648  ;;  %v1147_v27 = vsel %vm1141_vm15, %v1134_v0, %v838_v29 }
 0x110   : > { %v1160_v18 = vsel %vm1154_vm4, %v1147_v27, %v851_v50 }
 0x112   : > { %v3276_v6 = vpop.permute.xlu1 %623 }
 0x113   : > { %v1058_v47 = vsel %vm1050_vm9, %v2284_v5, %v3276_v6 }
 0x116   : > { %v1043_v52 = vpop.permute.xlu1 %1042  ;;  %v1351_v63 = vpop.permute.xlu0 %1350 }
 0x117   : > { %v1364_v41 = vsel %vm1362_vm1, %v3144_v38, %v1351_v63  ;;  %v1239_v38 = vsel %vm1235_vm3, %v1226_v9, %v1041_v22  ;;  %v2256_v22 = vld [vmem:[%s3438_s4 + $0x88] sm:$0xff]   ;;  %v1241_v3 = vsel %vm1235_vm3, %v1228_v13, %v1043_v52 }
 0x118   : > { %1576 = vmatprep.mubr.bf16.mxu0 %v1364_v41 }
 0x119   : > { %1577 = vmatmul.mubr.bf16.vlgmr.msra.gmra.mrb[0].mxu0 %v3163_v19  ;;  %v1234_v19 = vsel %vm1141_vm15, %v1222_v16, %v1024_v28  ;;  %v2285_v16 = vld [vmem:[%s2414_s12 + $0x20] sm:$0xff]  }
 0x11a   : > { %v909_v7 = vpop.permute.xlu1 %908  ;;  %v1353_v34 = vpop.permute.xlu0 %1352  ;;  %v1247_v40 = vsel %vm1235_vm3, %v1234_v19, %v1049_v30  ;;  %v1071_v30 = vsel %vm1063_vm10, %v1058_v47, %v3274_v21 }
 0x11b   : > { %v1367_v11 = vsel %vm1362_vm1, %v1239_v38, %v1353_v34  ;;  %v1173_v32 = vsel %vm1167_vm7, %v1160_v18, %v909_v7 }
 0x11c   : > { %1584 = vmatprep.mubr.bf16.mxu0 %v1367_v11 }
 0x11e   : > { %v673_v51 = vpop.permute.xlu1 %672  ;;  %v3307_v10 = vpop.permute.xlu0 %1360 }
 0x11f   : > { %v1379_v45 = vsel %vm1362_vm1, %v1247_v40, %v3307_v10 }
 0x120   : > { %1616 = vmatprep.mubr.bf16.mxu1 %v1379_v45 }
 0x121   : > { %1585 = vmatmul.mubr.bf16.gmra.mrb[4].mxu0 %v3265_v36  ;;  %1617 = vmatmul.mubr.bf16.vlgmr.msra.gmra.mrb[0].mxu1 %v1197_v23  ;;  %v1188_v36 = vsel %vm1180_vm5, %v1173_v32, %v3272_v14  ;;  %v1084_v14 = vsel %vm1076_vm8, %v1071_v30, %v673_v51 }
 0x122   : > { %v738_v1 = vpop.permute.xlu1 %737  ;;  %v1355_v24 = vpop.permute.xlu0 %1354  ;;  %2130 = vmatpush3.bf16.msra.mxu1 %v3085_v49  ;;  %2133 = vmatprep.mubr.msk.bf16.mxu1 %vm1089_vm11, %v1351_v63 }
 0x123   : > { %v1370_v15 = vsel %vm1362_vm1, %v1241_v3, %v1355_v24  ;;  %2131 = vmatprep.subr.bf16.mxu1 %v2256_v22 }
 0x124   : > { %1592 = vmatprep.mubr.bf16.mxu0 %v1370_v15 }
 0x126   : > { %v934_v46 = vpop.permute.xlu1 %933  ;;  %v714_v48 = vpop.permute.xlu0 %713  ;;  %2132 = vmatpush3.bf16.msra.mxu1 %v2256_v22 }
 0x127   : > { %v1097_v26 = vsel %vm1089_vm11, %v1084_v14, %v714_v48 }
 0x128   : > { %v1110_v31 = vsel %vm1102_vm12, %v1097_v26, %v738_v1 }
 0x129   : > { %1593 = vmatmul.mubr.bf16.gmra.mrb[8].mxu0 %v1188_v36  ;;  %2134 = vmatmul.mubr.msk.bf16.vlgmr.msra.gmra.mrb[4].mxu1 %vm1089_vm11, %v1353_v34 }
 0x12a   : > { %v814_v20 = vpop.permute.xlu1 %813  ;;  %v764_v49 = vpop.permute.xlu0 %763  ;;  %2137 = vmatprep.mubr.msk.bf16.mxu1 %vm1089_vm11, %v1355_v24 }
 0x12b   : > { %v1123_v50 = vsel %vm1115_vm13, %v1110_v31, %v764_v49  ;;  %v3376_v31 = vld [vmem:[%s3439_s5] ss:$0 sm:$0xff] }
 0x12c   : > { %v1136_v56 = vsel %vm1128_vm14, %v1123_v50, %v814_v20 }
 0x12e   : > { %v840_v54 = vpop.permute.xlu1 %839  ;;  %v957_v28 = vpop.permute.xlu0 %956 }
 0x12f   : > { %v1206_v12 = vsel %vm1063_vm10, %v934_v46, %v957_v28  ;;  %v1149_v52 = vsel %vm1141_vm15, %v1136_v56, %v840_v54 }
 0x132   : > { %v626_v57 = vpop.permute.xlu1 %625  ;;  %v997_v25 = vpop.permute.xlu0 %996 }
 0x133   : > { %v1218_v21 = vsel %vm1102_vm12, %v1206_v12, %v997_v25  ;;  %v1060_v34 = vsel %vm1050_vm9, %v2285_v16, %v626_v57 }
 0x136   : > { %v1045_v17 = vpop.permute.xlu1 %1044  ;;  %v1020_v60 = vpop.permute.xlu0 %1019 }
 0x137   : > { %v1230_v35 = vsel %vm1141_vm15, %v1218_v21, %v1020_v60 }
 0x138   : > { %v1243_v37 = vsel %vm1235_vm3, %v1230_v35, %v1045_v17 }
 0x13a   : > { %v911_v39 = vpop.permute.xlu1 %910  ;;  %v853_v29 = vpop.permute.xlu0 %852 }
 0x13b   : > { %v1162_v61 = vsel %vm1154_vm4, %v1149_v52, %v853_v29 }
 0x13c   : > { %v1175_v41 = vsel %vm1167_vm7, %v1162_v61, %v911_v39 }
 0x13d   : > { %v1191_v7 = vsel %vm1180_vm5, %v1175_v41, %v934_v46 }
 0x13e   : > { %v675_v6 = vpop.permute.xlu1 %674  ;;  %v651_v63 = vpop.permute.xlu0 %650 }
 0x13f   : > { %v1073_v11 = vsel %vm1063_vm10, %v1060_v34, %v651_v63 }
 0x140   : > { %v1086_v62 = vsel %vm1076_vm8, %v1073_v11, %v675_v6 }
 0x142   : > { %v740_v55 = vpop.permute.xlu1 %739  ;;  %v1357_v58 = vpop.permute.xlu0 %1356 }
 0x143   : > { %2138 = vmatmul.mubr.msk.bf16.gmra.mrb[8].mxu1 %vm1089_vm11, %v1357_v58  ;;  %v1373_v8 = vsel %vm1362_vm1, %v1243_v37, %v1357_v58 }
 0x144   : > { %1600 = vmatprep.mubr.bf16.mxu0 %v1373_v8 }
 0x145   : > { %1601 = vmatmul.mubr.bf16.gmra.mrb[12].mxu0 %v1191_v7 }
 0x146   : > { %v936_v9 = vpop.permute.xlu1 %935  ;;  %v716_v2 = vpop.permute.xlu0 %715 }
 0x147   : > { %v1099_v51 = vsel %vm1089_vm11, %v1086_v62, %v716_v2 }
 0x148   : > { %v1112_v44 = vsel %vm1102_vm12, %v1099_v51, %v740_v55 }
 0x14a   : > { %v816_v59 = vpop.permute.xlu1 %815  ;;  %v766_v38 = vpop.permute.xlu0 %765 }
 0x14b   : > { %v1125_v42 = vsel %vm1115_vm13, %v1112_v44, %v766_v38 }
 0x14c   : > { %v1138_v33 = vsel %vm1128_vm14, %v1125_v42, %v816_v59 }
 0x14e   : > { %v959_v43 = vpop.permute.xlu0 %958  ;;  %v842_v4 = vpop.permute.xlu1 %841 }
 0x14f   : > { %v1208_v0 = vsel %vm1063_vm10, %v936_v9, %v959_v43  ;;  %v1151_v23 = vsel %vm1141_vm15, %v1138_v33, %v842_v4 }
 0x152   : > { %v999_v53 = vpop.permute.xlu0 %998  ;;  %v855_v19 = vpop.permute.xlu1 %854 }
 0x153   : > { %v1220_v1 = vsel %vm1102_vm12, %v1208_v0, %v999_v53  ;;  %v1164_v13 = vsel %vm1154_vm4, %v1151_v23, %v855_v19 }
 0x156   : > { %v1022_v40 = vpop.permute.xlu0 %1021  ;;  %v913_v45 = vpop.permute.xlu1 %912 }
 0x157   : > { %v1232_v27 = vsel %vm1141_vm15, %v1220_v1, %v1022_v40  ;;  %v1177_v3 = vsel %vm1167_vm7, %v1164_v13, %v913_v45 }
 0x158   : > { %v1194_v46 = vsel %vm1180_vm5, %v1177_v3, %v936_v9  ;;  %vm1815_vm5 = vcmask 125952  }
 0x15a   : > { %v1047_v22 = vpop.permute.xlu0 %1046 }
 0x15b   : > { %v1245_v24 = vsel %vm1235_vm3, %v1232_v27, %v1047_v22 }
 0x15e   : > { %v1359_v15 = vpop.permute.xlu0 %1358 }
 0x15f   : > { %2141 = vmatprep.mubr.msk.bf16.mxu1 %vm1089_vm11, %v1359_v15  ;;  %v1376_v18 = vsel %vm1362_vm1, %v1245_v24, %v1359_v15 }
 0x160   : > { %1608 = vmatprep.mubr.bf16.mxu0 %v1376_v18  ;;  %2142 = vmatmul.mubr.msk.bf16.gmra.mrb[12].mxu1 %vm1089_vm11, %v3307_v10 }
 0x161   : > { %1609 = vmatmul.mubr.bf16.gmra.mrb[16].mxu0 %v1194_v46 }
 0x1ec   : > { %v2085_v32 = vpop.f32.mrb[0].mxu0 }
 0x1ed   : > { %v2086_v48 = vpop.f32.mrb[1].mxu0 }
 0x1ee   : > { %v2087_v36 = vadd.f32 %v2086_v48, %v2085_v32  ;;  %v2088_v20 = vpop.f32.mrb[2].mxu0 }
 0x1ef   : > { %v2089_v49 = vpop.f32.mrb[3].mxu0 }
 0x1f0   : > { %v2090_v54 = vadd.f32 %v2089_v49, %v2088_v20  ;;  %v1579_v56 = vadd.f32 %v2087_v36, %v3376_v31 }
 0x1f2   : > { %v1582_v41 = vadd.f32 %v2090_v54, %v3376_v31 }
 0x1f4   : > { %v2091_v28 = vpop.f32.mrb[4].mxu0  ;;  %v2115_v5 = vpop.f32.mrb[0].mxu1 }
 0x1f5   : > { %v2092_v47 = vpop.f32.mrb[5].mxu0  ;;  %v2116_v57 = vpop.f32.mrb[1].mxu1 }
 0x1f6   : > { %v2093_v25 = vadd.f32 %v2092_v47, %v2091_v28  ;;  %v3371_v30 = vadd.f32 %v2116_v57, %v2115_v5  ;;  %v2094_v14 = vpop.f32.mrb[6].mxu0  ;;  %v2118_v17 = vpop.f32.mrb[2].mxu1 }
 0x1f7   : > { %v2095_v26 = vpop.f32.mrb[7].mxu0  ;;  %v2119_v10 = vpop.f32.mrb[3].mxu1 }
 0x1f8   : > { %v2096_v60 = vadd.f32 %v2095_v26, %v2094_v14  ;;  %v1587_v39 = vadd.f32 %v2093_v25, %v3376_v31 }
 0x1fa   : > { %v1590_v21 = vadd.f32 %v2096_v60, %v3376_v31 }
 0x1fc   : > { %v2097_v50 = vpop.f32.mrb[8].mxu0  ;;  %v2135_v29 = vpop.f32.mrb[4].mxu1 }
 0x1fd   : > { %v1667_v6 = vadd.f32 %v2135_v29, %v1587_v39  ;;  %v2098_v12 = vpop.f32.mrb[9].mxu0  ;;  %v1658_v52 = vpop.f32.mrb[5].mxu1 }
 0x1fe   : > { %v2099_v61 = vadd.f32 %v2098_v12, %v2097_v50  ;;  %v1659_v63 = vadd.f32 %v1658_v52, %v1579_v56  ;;  %v2100_v35 = vpop.f32.mrb[10].mxu0  ;;  %v2136_v55 = vpop.f32.mrb[6].mxu1 }
 0x1ff   : > { %v1717_v37 = vmin.f32 %v1667_v6, 0.0  ;;  %v1670_v58 = vadd.f32 %v2136_v55, %v1590_v21  ;;  %v2101_v8 = vpop.f32.mrb[11].mxu0  ;;  %v1661_v7 = vpop.f32.mrb[7].mxu1  ;;  %vm1706_vm2 = vcmp.gt.f32.partialorder %v1667_v6, 0.0 }
 0x200   : > { %v1715_v9 = vmin.f32 %v1659_v63, 0.0  ;;  %v2102_v2 = vadd.f32 %v2101_v8, %v2100_v35  ;;  %v1662_v59 = vadd.f32 %v1661_v7, %v1582_v41  ;;  %vm1704_vm8 = vcmp.gt.f32.partialorder %v1659_v63, 0.0 }
 0x201   : > { %v1730_v38 = vmul.f32 1.442695, %v1717_v37  ;;  %v1718_v16 = vmin.f32 %v1670_v58, 0.0  ;;  %vm1707_vm9 = vcmp.gt.f32.partialorder %v1670_v58, 0.0  ;;  %v1595_v15 = vadd.f32 %v2099_v61, %v3376_v31 }
 0x202   : > { %v1726_v34 = vmul.f32 1.442695, %v1715_v9  ;;  %v1716_v43 = vmin.f32 %v1662_v59, 0.0  ;;  %vm1705_vm10 = vcmp.gt.f32.partialorder %v1662_v59, 0.0  ;;  %v1598_v36 = vadd.f32 %v2102_v2, %v3376_v31 }
 0x203   : > { %2257 = vpow2.f32 %v1730_v38  ;;  %v1732_v4 = vmul.f32 1.442695, %v1718_v16  ;;  %v1619_v38 = vadd.f32 %v3371_v30, %v3376_v31 }
 0x204   : > { %2259 = vpow2.f32 %v1726_v34  ;;  %v1728_v11 = vmul.f32 1.442695, %v1716_v43 }
 0x205   : > { %2261 = vpow2.f32 %v1732_v4 }
 0x206   : > { %2263 = vpow2.f32 %v1728_v11 }
 0x20d   : > { %v2258_v62 = vpop.eup %2257 }
 0x20e   : > { %v2260_v53 = vpop.eup %2259  ;;  %v2036_v51 = vadd.f32 -1.0, %v2258_v62 }
 0x20f   : > { %v2262_v19 = vpop.eup %2261  ;;  %v2034_v44 = vadd.f32 -1.0, %v2260_v53 }
 0x210   : > { %v2264_v40 = vpop.eup %2263  ;;  %v1761_v42 = vsel %vm1706_vm2, %v1667_v6, %v2036_v51  ;;  %v2037_v33 = vadd.f32 -1.0, %v2262_v19 }
 0x211   : > { %v2060_v45 = vpack.c.bf16 %v1761_v42, %v1761_v42  ;;  %v1759_v22 = vsel %vm1704_vm8, %v1659_v63, %v2034_v44  ;;  %v2035_v0 = vadd.f32 -1.0, %v2264_v40 }
 0x212   : > { %v2058_v23 = vpack.c.bf16 %v1759_v22, %v1759_v22  ;;  %v1762_v1 = vsel %vm1707_vm9, %v1670_v58, %v2037_v33 }
 0x213   : > { %1818 = vst.msk [vmem:[%s3387_s7 + $0x8] sm:$0xf] %vm1815_vm5, %v2060_v45  ;;  %v2061_v13 = vpack.c.bf16 %v1762_v1, %v1762_v1  ;;  %v1760_v27 = vsel %vm1705_vm10, %v1662_v59, %v2035_v0 }
 0x214   : > { %1816 = vst.msk [vmem:[%s3387_s7] sm:$0xf] %vm1815_vm5, %v2058_v23  ;;  %v2059_v3 = vpack.c.bf16 %v1760_v27, %v1760_v27 }
 0x215   : > { %1819 = vst.msk [vmem:[%s3387_s7 + $0xc] sm:$0xf] %vm1815_vm5, %v2061_v13 }
 0x216   : > { %1817 = vst.msk [vmem:[%s3387_s7 + $0x4] sm:$0xf] %vm1815_vm5, %v2059_v3  ;;  %v2139_v24 = vpop.f32.mrb[8].mxu1 }
 0x217   : > { %v1674_v18 = vpop.f32.mrb[9].mxu1 }
 0x218   : > { %v1675_v46 = vadd.f32 %v1674_v18, %v1595_v15  ;;  %v2103_v32 = vpop.f32.mrb[12].mxu0  ;;  %v2140_v48 = vpop.f32.mrb[10].mxu1 }
 0x219   : > { %v2104_v20 = vpop.f32.mrb[13].mxu0  ;;  %v1677_v49 = vpop.f32.mrb[11].mxu1 }
 0x21a   : > { %v1719_v54 = vmin.f32 %v1675_v46, 0.0  ;;  %v2105_v28 = vadd.f32 %v2104_v20, %v2103_v32  ;;  %v1678_v5 = vadd.f32 %v1677_v49, %v1598_v36  ;;  %v2106_v47 = vpop.f32.mrb[14].mxu0  ;;  %vm1708_vm11 = vcmp.gt.f32.partialorder %v1675_v46, 0.0 }
 0x21b   : > { %v2107_v57 = vpop.f32.mrb[15].mxu0 }
 0x21c   : > { %v1734_v25 = vmul.f32 1.442695, %v1719_v54  ;;  %v1603_v14 = vadd.f32 %v2105_v28, %v3376_v31  ;;  %v1720_v17 = vmin.f32 %v1678_v5, 0.0  ;;  %v2108_v26 = vadd.f32 %v2107_v57, %v2106_v47 }
 0x21d   : > { %vm1709_vm12 = vcmp.gt.f32.partialorder %v1678_v5, 0.0 }
 0x21e   : > { %2265 = vpow2.f32 %v1734_v25  ;;  %v1683_v10 = vadd.f32 %v2139_v24, %v1603_v14  ;;  %v1736_v60 = vmul.f32 1.442695, %v1720_v17  ;;  %v1606_v39 = vadd.f32 %v2108_v26, %v3376_v31 }
 0x220   : > { %v1721_v50 = vmin.f32 %v1683_v10, 0.0  ;;  %2267 = vpow2.f32 %v1736_v60  ;;  %v1686_v29 = vadd.f32 %v2140_v48, %v1606_v39  ;;  %vm1710_vm13 = vcmp.gt.f32.partialorder %v1683_v10, 0.0 }
 0x222   : > { %v1738_v56 = vmul.f32 1.442695, %v1721_v50  ;;  %v1722_v6 = vmin.f32 %v1686_v29, 0.0  ;;  %vm1711_vm14 = vcmp.gt.f32.partialorder %v1686_v29, 0.0 }
 0x224   : > { %2269 = vpow2.f32 %v1738_v56  ;;  %v1740_v12 = vmul.f32 1.442695, %v1722_v6 }
 0x226   : > { %2271 = vpow2.f32 %v1740_v12 }
 0x228   : > { %v2266_v52 = vpop.eup %2265 }
 0x229   : > { %v2038_v21 = vadd.f32 -1.0, %v2266_v52 }
 0x22a   : > { %v2268_v61 = vpop.eup %2267 }
 0x22b   : > { %v1763_v63 = vsel %vm1708_vm11, %v1675_v46, %v2038_v21  ;;  %v2039_v35 = vadd.f32 -1.0, %v2268_v61 }
 0x22c   : > { %v2062_v55 = vpack.c.bf16 %v1763_v63, %v1763_v63 }
 0x22d   : > { %v1764_v41 = vsel %vm1709_vm12, %v1678_v5, %v2039_v35 }
 0x22e   : > { %v2270_v37 = vpop.eup %2269  ;;  %1820 = vst.msk [vmem:[%s3387_s7 + $0x10] sm:$0xf] %vm1815_vm5, %v2062_v55  ;;  %v2063_v58 = vpack.c.bf16 %v1764_v41, %v1764_v41 }
 0x22f   : > { %v2040_v8 = vadd.f32 -1.0, %v2270_v37 }
 0x230   : > { %1821 = vst.msk [vmem:[%s3387_s7 + $0x14] sm:$0xf] %vm1815_vm5, %v2063_v58  ;;  %v2272_v7 = vpop.eup %2271 }
 0x231   : > { %v1765_v9 = vsel %vm1710_vm13, %v1683_v10, %v2040_v8  ;;  %v2041_v59 = vadd.f32 -1.0, %v2272_v7 }
 0x232   : > { %v2064_v2 = vpack.c.bf16 %v1765_v9, %v1765_v9 }
 0x233   : > { %v2143_v16 = vpop.f32.mrb[12].mxu1  ;;  %v1766_v34 = vsel %vm1711_vm14, %v1686_v29, %v2041_v59 }
 0x234   : > { %1822 = vst.msk [vmem:[%s3387_s7 + $0x18] sm:$0xf] %vm1815_vm5, %v2064_v2  ;;  %v1699_v43 = vadd.f32 %v2143_v16, %v1619_v38  ;;  %v2109_v4 = vpop.f32.mrb[16].mxu0  ;;  %v1690_v11 = vpop.f32.mrb[13].mxu1  ;;  %v2065_v62 = vpack.c.bf16 %v1766_v34, %v1766_v34 }
 0x235   : > { %v2110_v53 = vpop.f32.mrb[17].mxu0  ;;  %v2144_v51 = vpop.f32.mrb[14].mxu1 }
 0x236   : > { %v1725_v19 = vmin.f32 %v1699_v43, 0.0  ;;  %v2111_v44 = vadd.f32 %v2110_v53, %v2109_v4  ;;  %v2112_v40 = vpop.f32.mrb[18].mxu0  ;;  %v1693_v42 = vpop.f32.mrb[15].mxu1  ;;  %1823 = vst.msk [vmem:[%s3387_s7 + $0x1c] sm:$0xf] %vm1815_vm5, %v2065_v62  ;;  %vm1714_vm15 = vcmp.gt.f32.partialorder %v1699_v43, 0.0 }
 0x237   : > { %v2113_v33 = vpop.f32.mrb[19].mxu0 }
 0x238   : > { %v1746_v45 = vmul.f32 1.442695, %v1725_v19  ;;  %v1611_v30 = vadd.f32 %v2111_v44, %v3376_v31  ;;  %v2114_v22 = vadd.f32 %v2113_v33, %v2112_v40 }
 0x23a   : > { %2273 = vpow2.f32 %v1746_v45  ;;  %v1691_v0 = vadd.f32 %v1690_v11, %v1611_v30  ;;  %v1614_v23 = vadd.f32 %v2114_v22, %v3376_v31 }
 0x23c   : > { %v1723_v1 = vmin.f32 %v1691_v0, 0.0  ;;  %v1694_v13 = vadd.f32 %v1693_v42, %v1614_v23  ;;  %vm1712_vm3 = vcmp.gt.f32.partialorder %v1691_v0, 0.0 }
 0x23e   : > { %v1742_v27 = vmul.f32 1.442695, %v1723_v1  ;;  %v1724_v3 = vmin.f32 %v1694_v13, 0.0  ;;  %vm1713_vm4 = vcmp.gt.f32.partialorder %v1694_v13, 0.0 }
 0x240   : > { %2275 = vpow2.f32 %v1742_v27  ;;  %v1744_v24 = vmul.f32 1.442695, %v1724_v3 }
 0x242   : > { %2277 = vpow2.f32 %v1744_v24 }
 0x244   : > { %v2274_v15 = vpop.eup %2273 }
 0x245   : > { %v2044_v18 = vadd.f32 -1.0, %v2274_v15 }
 0x247   : > { %v1769_v46 = vsel %vm1714_vm15, %v1699_v43, %v2044_v18 }
 0x248   : > { %v2068_v32 = vpack.c.bf16 %v1769_v46, %v1769_v46 }
 0x24a   : > { %v2276_v48 = vpop.eup %2275  ;;  %1826 = vst.msk [vmem:[%s3387_s7 + $0x28] sm:$0xf] %vm1815_vm5, %v2068_v32 }
 0x24b   : > { %v2042_v36 = vadd.f32 -1.0, %v2276_v48 }
 0x24c   : > { %v2278_v20 = vpop.eup %2277 }
 0x24d   : > { %v1767_v31 = vsel %vm1712_vm3, %v1691_v0, %v2042_v36  ;;  %v2043_v49 = vadd.f32 -1.0, %v2278_v20 }
 0x24e   : > { %v2066_v54 = vpack.c.bf16 %v1767_v31, %v1767_v31 }
 0x24f   : > { %v1768_v28 = vsel %vm1713_vm4, %v1694_v13, %v2043_v49 }
 0x250   : > { %1824 = vst.msk [vmem:[%s3387_s7 + $0x20] sm:$0xf] %vm1815_vm5, %v2066_v54  ;;  %v2067_v5 = vpack.c.bf16 %v1768_v28, %v1768_v28 }
 0x252   : > { %1825 = vst.msk [vmem:[%s3387_s7 + $0x24] sm:$0xf] %vm1815_vm5, %v2067_v5 }
 0x253 PF: > { %s16_s25 = sadd.s32 1, %s2324_s25   ;;  %s3491_s21 = smov %s2316_s23 }
 0x254   : > { %p13_p8 = scmp.ge.s32.totalorder %s16_s25, 10   ;;  %s3492_s22 = smov %s2320_s24 }
 0x255   : > { %s3493_s23 = smov %s3496_s26  ;;  %s3494_s24 = smov %s3500_s27 }
 0x256   :  { %15 = sbr.rel (!%p13_p8) target bundleno = 3 (0x3), region = 83 }

</bundles_post_ra>
